<compile_context>
chip_gen: v7x
topology: tpu7x:2x2x1
jax: 0.10.0
libtpu: 0.0.40
codegen_flags: <defaults>
</compile_context>

<pallas_src>
import functools

import jax
import jax.numpy as jnp
from jax import lax
from jax.experimental import pallas as pl
from jax.experimental.pallas import tpu as pltpu


# ----------------------------------------------------------------------------
# fused kernel: localization CNN + fc_loc + affine_grid + grid_sample
# (one grid step per BT-sized batch block)
# ----------------------------------------------------------------------------
def _stn_kernel(dims, xc1_ref, xrows_ref, t1_ref, b1_ref, t2_ref, b2_ref,
                wfct_ref, bfc_ref, xn_ref, yn_ref, o_ref):
    (BT, C, H, W, Hp, Wp, Hp2, Wp2, K2k, K2, N2p, HWp) = dims
    C2 = C // 2
    n1 = C2 * Wp            # stage-1 pooled plane row width (channel x width)
    nh2 = 2 * Hp2           # conv-2 output rows actually needed by the pool
    nwk = Wp2 * K2
    twoHp = 2 * Hp

    # step constants, shared by all BT batch elements in this block
    xn = xn_ref[...]                                            # [1, HWp]
    yn = yn_ref[...]                                            # [1, HWp]
    iota_x = lax.broadcasted_iota(jnp.int32, (W, HWp), 0).astype(jnp.float32)
    iota_y = lax.broadcasted_iota(jnp.int32, (H, HWp), 0).astype(jnp.float32)

    # ---- stage 1 (all BT at once): conv 7x7 (C -> C/2) as one matmul --------
    # Even/odd pooled rows live in sublane halves per batch element, even/odd
    # pooled cols in lane halves, so MaxPool2d(2,2) is a max of four blocks.
    conv1q_all = jnp.dot(xc1_ref[0], t1_ref[...],
                         preferred_element_type=jnp.float32)    # [BT*2Hp, 2n1]

    for bt in range(BT):                      # static unroll, BT is small
        q1 = conv1q_all[bt * twoHp:(bt + 1) * twoHp, :]         # [2Hp, 2n1]
        pool1 = jnp.maximum(
            jnp.maximum(q1[:Hp, :n1], q1[:Hp, n1:]),
            jnp.maximum(q1[Hp:, :n1], q1[Hp:, n1:]))            # 2x2 maxpool
        planes1 = jnp.maximum(pool1 + b1_ref[...], 0.0)         # bias + relu

        # ---- stage 2: conv 5x5 (C/2 -> 10) + maxpool + relu + avg + linear --
        fmat = jnp.dot(planes1, t2_ref[...],
                       preferred_element_type=jnp.float32)      # [Hp, K2k*N2p]
        conv2m = b2_ref[...]                                    # [1, N2p]
        for ky in range(K2k):        # fold kernel-row shifts (128-lane blocks)
            conv2m = conv2m + fmat[ky:ky + nh2, ky * N2p:(ky + 1) * N2p]
        colmax = jnp.maximum(conv2m[:, :nwk], conv2m[:, nwk:2 * nwk])  # pool W
        srow = jnp.zeros((1, nwk), jnp.float32)
        for hp2 in range(Hp2):                                  # pool H + relu
            srow = srow + jnp.maximum(
                jnp.maximum(colmax[2 * hp2:2 * hp2 + 1, :],
                            colmax[2 * hp2 + 1:2 * hp2 + 2, :]), 0.0)
        feat = jnp.zeros((1, K2), jnp.float32)
        for wp2 in range(Wp2):                                  # adaptive avg
            feat = feat + srow[:, wp2 * K2:(wp2 + 1) * K2]
        feat = feat * (1.0 / float(Hp2 * Wp2))                  # [1, 10]
        theta = jnp.dot(feat, wfct_ref[...],
                        preferred_element_type=jnp.float32) + bfc_ref[...]

        # ---- stage 3: affine_grid + bilinear grid_sample, separable one-hot -
        t00 = theta[0:1, 0:1]; t01 = theta[0:1, 1:2]; t02 = theta[0:1, 2:3]
        t10 = theta[0:1, 3:4]; t11 = theta[0:1, 4:5]; t12 = theta[0:1, 5:6]
        gx = t00 * xn + t01 * yn + t02                          # [1, HWp]
        gy = t10 * xn + t11 * yn + t12
        ix = ((gx + 1.0) * W - 1.0) * 0.5      # grid_sample un-normalize
        iy = ((gy + 1.0) * H - 1.0) * 0.5      # (align_corners=False)
        x0 = jnp.floor(ix); y0 = jnp.floor(iy)
        wx1 = ix - x0; wx0 = 1.0 - wx1
        wy1 = iy - y0; wy0 = 1.0 - wy1
        # One-hot factors span only valid indices, so out-of-bounds corners
        # contribute nothing -> zeros padding handled for free.
        # NOTE: cxT/ryT could be bf16 on v6e/v7x; kept f32 for v5e portability.
        cxT = (jnp.where(iota_x == x0, wx0, 0.0) +
               jnp.where(iota_x == x0 + 1.0, wx1, 0.0))         # [W, HWp]
        ryT = (jnp.where(iota_y == y0, wy0, 0.0) +
               jnp.where(iota_y == y0 + 1.0, wy1, 0.0))         # [H, HWp]

        colg = jnp.dot(xrows_ref[bt], cxT,
                       preferred_element_type=jnp.float32)      # [C*H, HWp]
        rows = []
        for c in range(C):
            blk = colg[c * H:(c + 1) * H, :]   # sublane-aligned when H % 8 == 0
            rows.append(jnp.sum(blk * ryT, axis=0, keepdims=True))
        o_ref[bt] = jnp.concatenate(rows, axis=0).astype(o_ref.dtype)


# ----------------------------------------------------------------------------
# wrapper-side layout plumbing (pure data movement / weight reshuffles)
# ----------------------------------------------------------------------------
def _im2col_stage1(x, Hp, K1):
    # xc1[b, dh*Hp + hp, (ci*K1 + ky)*W + w] = x[b, ci, 2*hp + dh + ky, w]
    # TODO(synk): for much larger H/W this slab inflates HBM bytes ~5x; move
    # the im2col inside the kernel with pl.ds row windows in that regime.
    B, C, H, W = x.shape
    dh = jnp.arange(2)
    hp = jnp.arange(Hp)
    ky = jnp.arange(K1)
    rows = 2 * hp[None, :, None] + dh[:, None, None] + ky[None, None, :]
    g = x[:, :, rows, :]                       # [B, C, 2, Hp, K1, W]
    g = jnp.transpose(g, (0, 2, 3, 1, 4, 5))   # [B, 2, Hp, C, K1, W]
    return g.reshape(B, 2 * Hp, C * K1 * W)


def _toeplitz_stage1(w1, W, Wp):
    # t1[(ci*K + ky)*W + w, dw*(C2*Wp) + co*Wp + wp] = w1[co, ci, ky, kx]
    #   with kx = w - (2*wp + dw), zero outside the valid band.
    C2o, Cin, K, _ = w1.shape
    w_idx = jnp.arange(W)
    dw = jnp.arange(2)
    wp = jnp.arange(Wp)
    kx = w_idx[:, None, None] - (2 * wp[None, None, :] + dw[None, :, None])
    valid = ((kx >= 0) & (kx < K)).astype(w1.dtype)
    kxc = jnp.clip(kx, 0, K - 1)
    g = w1[:, :, :, kxc] * valid[None, None, None]       # [C2o,Cin,K,W,2,Wp]
    g = jnp.transpose(g, (1, 2, 3, 4, 0, 5))             # [Cin,K,W,2,C2o,Wp]
    return g.reshape(Cin * K * W, 2 * C2o * Wp)


def _toeplitz_stage2(w2, Wp, Wp2, N2p):
    # t2[ci*Wp + w, ky*N2p + (dw*Wp2 + wp2)*K2 + k] = w2[k, ci, ky, kx]
    #   with kx = w - (2*wp2 + dw); each ky block is padded to N2p lanes.
    K2, C2, K, _ = w2.shape
    w_idx = jnp.arange(Wp)
    dw = jnp.arange(2)
    wp2 = jnp.arange(Wp2)
    kx = w_idx[:, None, None] - (2 * wp2[None, None, :] + dw[None, :, None])
    valid = ((kx >= 0) & (kx < K)).astype(w2.dtype)
    kxc = jnp.clip(kx, 0, K - 1)
    g = w2[:, :, :, kxc] * valid[None, None, None]       # [K2,C2,K,Wp,2,Wp2]
    g = jnp.transpose(g, (1, 3, 2, 4, 5, 0))             # [C2,Wp,K,2,Wp2,K2]
    N2 = 2 * Wp2 * K2
    g = g.reshape(C2 * Wp, K, N2)
    g = jnp.pad(g, ((0, 0), (0, 0), (0, N2p - N2)))
    return g.reshape(C2 * Wp, K * N2p)


def init_params(key, n_channels):
    c2 = n_channels // 2
    ks = jax.random.split(key, 6)

    def u(k, shape, fan_in):
        bound = 1.0 / jnp.sqrt(float(fan_in))
        return jax.random.uniform(k, shape, jnp.float32, -bound, bound)

    return dict(
        w1=u(ks[0], (c2, n_channels, 7, 7), n_channels * 49),
        b1=u(ks[1], (c2,), n_channels * 49),
        w2=u(ks[2], (10, c2, 5, 5), c2 * 25),
        b2=u(ks[3], (10,), c2 * 25),
        wfc=u(ks[4], (6, 10), 10),
        bfc=u(ks[5], (6,), 10),
    )


def prepare_stn(params, n_channels, H, W):
    """One-time preprocessing of the weights + spatial constants.

    Call once per (weights, H, W); the jitted forward then only does an
    im2col reshape and the fused pallas_call (no per-call Toeplitz rebuild)."""
    C = n_channels
    C2 = C // 2
    K1, K2k, K2 = 7, 5, 10
    Hp, Wp = (H - K1 + 1) // 2, (W - K1 + 1) // 2
    Hp2, Wp2 = (Hp - K2k + 1) // 2, (Wp - K2k + 1) // 2
    N2 = 2 * Wp2 * K2
    N2p = ((N2 + 127) // 128) * 128
    HW = H * W
    HWp = ((HW + 127) // 128) * 128

    t1 = _toeplitz_stage1(params["w1"].astype(jnp.float32), W, Wp)
    t2 = _toeplitz_stage2(params["w2"].astype(jnp.float32), Wp, Wp2, N2p)
    b1row = jnp.repeat(params["b1"].astype(jnp.float32), Wp).reshape(1, C2 * Wp)
    b2row = jnp.pad(jnp.tile(params["b2"].astype(jnp.float32), 2 * Wp2),
                    (0, N2p - N2)).reshape(1, N2p)
    wfct = params["wfc"].astype(jnp.float32).T                    # [10, 6]
    bfcr = params["bfc"].astype(jnp.float32).reshape(1, 6)

    # affine_grid base coordinates per (padded) output pixel, exact int math
    p = jnp.arange(HWp, dtype=jnp.int32)
    i = p // W
    j = p - i * W
    xn = ((2.0 * j.astype(jnp.float32) + 1.0) / W - 1.0).reshape(1, HWp)
    yn = ((2.0 * i.astype(jnp.float32) + 1.0) / H - 1.0).reshape(1, HWp)

    return dict(t1=t1, b1row=b1row, t2=t2, b2row=b2row, wfct=wfct, bfcr=bfcr,
                xn=xn, yn=yn)


def _pick_bt(B):
    # amortize per-step pipeline overhead, but keep >=2 grid steps so v7x's
    # two TensorCores both get work under dimension_semantics=("parallel",)
    for bt in (8, 4, 2):
        if B % bt == 0 and B // bt >= 2:
            return bt
    return 1


@jax.jit
def stn_forward(x, prep):
    x = x.astype(jnp.float32)
    B, C, H, W = x.shape
    C2 = C // 2
    K1, K2k, K2 = 7, 5, 10
    Hp, Wp = (H - K1 + 1) // 2, (W - K1 + 1) // 2
    Hp2, Wp2 = (Hp - K2k + 1) // 2, (Wp - K2k + 1) // 2
    assert Hp2 >= 1 and Wp2 >= 1, "spatial size too small for localization CNN"
    N2 = 2 * Wp2 * K2
    N2p = ((N2 + 127) // 128) * 128
    HW = H * W
    HWp = ((HW + 127) // 128) * 128        # lane-dense sampled output
    BT = _pick_bt(B)
    nsteps = B // BT

    # stage-1 im2col slab, stacked per grid step so conv1 is one fat-M matmul
    xc1 = _im2col_stage1(x, Hp, K1).reshape(nsteps, BT * 2 * Hp, C * K1 * W)
    xrows = x.reshape(B, C * H, W)          # [C*H, W] rows for the x-gather

    dims = (BT, C, H, W, Hp, Wp, Hp2, Wp2, K2k, K2, N2p, HWp)

    flops = 2 * B * ((2 * Hp) * (C * K1 * W) * (2 * C2 * Wp)     # conv1
                     + Hp * (C2 * Wp) * (K2k * N2p)              # conv2
                     + K2 * 6                                    # fc_loc
                     + (C * H) * W * HWp)                        # grid_sample
    bytes_accessed = 4 * (xc1.size + xrows.size + prep["t1"].size
                          + prep["t2"].size + prep["b1row"].size
                          + prep["b2row"].size + prep["wfct"].size
                          + prep["bfcr"].size + prep["xn"].size
                          + prep["yn"].size + B * C * HWp)

    out_pad = pl.pallas_call(
        functools.partial(_stn_kernel, dims),
        out_shape=jax.ShapeDtypeStruct((B, C, HWp), jnp.float32),
        grid=(nsteps,),
        in_specs=[
            pl.BlockSpec((1, BT * 2 * Hp, C * K1 * W), lambda s: (s, 0, 0)),
            pl.BlockSpec((BT, C * H, W), lambda s: (s, 0, 0)),           # xrows
            pl.BlockSpec((C * K1 * W, 2 * C2 * Wp), lambda s: (0, 0)),   # t1
            pl.BlockSpec((1, C2 * Wp), lambda s: (0, 0)),                # b1 row
            pl.BlockSpec((C2 * Wp, K2k * N2p), lambda s: (0, 0)),        # t2
            pl.BlockSpec((1, N2p), lambda s: (0, 0)),                    # b2 row
            pl.BlockSpec((K2, 6), lambda s: (0, 0)),                     # wfc^T
            pl.BlockSpec((1, 6), lambda s: (0, 0)),                      # bfc
            pl.BlockSpec((1, HWp), lambda s: (0, 0)),                    # xn
            pl.BlockSpec((1, HWp), lambda s: (0, 0)),                    # yn
        ],
        out_specs=pl.BlockSpec((BT, C, HWp), lambda s: (s, 0, 0)),
        compiler_params=pltpu.CompilerParams(
            dimension_semantics=("parallel",),
            vmem_limit_bytes=32 * 1024 * 1024),
        cost_estimate=pl.CostEstimate(flops=flops, transcendentals=0,
                                      bytes_accessed=bytes_accessed),
    )(xc1, xrows, prep["t1"], prep["b1row"], prep["t2"], prep["b2row"],
      prep["wfct"], prep["bfcr"], prep["xn"], prep["yn"])

    return out_pad[:, :, :HW].reshape(B, C, H, W)


if __name__ == "__main__":
    key = jax.random.PRNGKey(0)
    kx, kp = jax.random.split(key)
    # spatial must be >= 18 so the localization CNN keeps a non-empty feature
    # map (7x7 conv -> pool -> 5x5 conv -> pool); 16x16 would collapse to 0.
    B, C, H, W = 2, 4, 24, 24
    x = jax.random.normal(kx, (B, C, H, W), jnp.float32)
    params = init_params(kp, C)

    # self-check: with fc_loc forcing theta = identity, affine_grid +
    # grid_sample must reproduce the input (up to MXU bf16-pass rounding).
    params_id = dict(params)
    params_id["wfc"] = jnp.zeros((6, 10), jnp.float32)
    params_id["bfc"] = jnp.array([1.0, 0.0, 0.0, 0.0, 1.0, 0.0], jnp.float32)
    prep_id = prepare_stn(params_id, C, H, W)
    out_id = jax.block_until_ready(stn_forward(x, prep_id))
    err = float(jnp.max(jnp.abs(out_id - x)))
    assert err < 5e-2, f"identity-theta check failed, max err {err}"

    prep = prepare_stn(params, C, H, W)    # one-time weight preprocessing
    out = jax.block_until_ready(stn_forward(x, prep))
    assert out.shape == (B, C, H, W), out.shape
    assert out.dtype == jnp.float32
    assert bool(jnp.all(jnp.isfinite(out)))
    print("KERNEL_OK")
</pallas_src>

<mosaic_0001>
module attributes {stable_mosaic.version = 11 : i64} {
  func.func @_stn_kernel(%arg0: i32, %arg1: memref<1x18x672xf32, #tpu.memory_space<vmem>>, %arg2: memref<1x96x24xf32, #tpu.memory_space<vmem>>, %arg3: memref<672x36xf32, #tpu.memory_space<vmem>>, %arg4: memref<1x18xf32, #tpu.memory_space<vmem>>, %arg5: memref<18x640xf32, #tpu.memory_space<vmem>>, %arg6: memref<1x128xf32, #tpu.memory_space<vmem>>, %arg7: memref<10x6xf32, #tpu.memory_space<vmem>>, %arg8: memref<1x6xf32, #tpu.memory_space<vmem>>, %arg9: memref<1x640xf32, #tpu.memory_space<vmem>>, %arg10: memref<1x640xf32, #tpu.memory_space<vmem>>, %arg11: memref<1x4x640xf32, #tpu.memory_space<vmem>>) attributes {dimension_semantics = [#tpu.dimension_semantics<parallel>], iteration_bounds = array<i64: 2>, scalar_prefetch = 0 : i64, scratch_operands = 0 : i64, tpu.core_type = #tpu.core_type<tc>, window_params = [{transform_indices = @transform_0, window_bounds = array<i64: 1, 18, 672>}, {transform_indices = @transform_1, window_bounds = array<i64: 1, 96, 24>}, {pipeline_mode = #tpu.pipeline_mode<synchronous>, transform_indices = @transform_2, window_bounds = array<i64: 672, 36>}, {pipeline_mode = #tpu.pipeline_mode<synchronous>, transform_indices = @transform_3, window_bounds = array<i64: 1, 18>}, {pipeline_mode = #tpu.pipeline_mode<synchronous>, transform_indices = @transform_4, window_bounds = array<i64: 18, 640>}, {pipeline_mode = #tpu.pipeline_mode<synchronous>, transform_indices = @transform_5, window_bounds = array<i64: 1, 128>}, {pipeline_mode = #tpu.pipeline_mode<synchronous>, transform_indices = @transform_6, window_bounds = array<i64: 10, 6>}, {pipeline_mode = #tpu.pipeline_mode<synchronous>, transform_indices = @transform_7, window_bounds = array<i64: 1, 6>}, {pipeline_mode = #tpu.pipeline_mode<synchronous>, transform_indices = @transform_8, window_bounds = array<i64: 1, 640>}, {pipeline_mode = #tpu.pipeline_mode<synchronous>, transform_indices = @transform_9, window_bounds = array<i64: 1, 640>}, {transform_indices = @transform_10, window_bounds = array<i64: 1, 4, 640>}]} {
    %c0 = arith.constant 0 : index
    %c0_0 = arith.constant 0 : index
    %0 = vector.load %arg9[%c0, %c0_0] : memref<1x640xf32, #tpu.memory_space<vmem>>, vector<1x640xf32>
    %c0_1 = arith.constant 0 : index
    %c0_2 = arith.constant 0 : index
    %1 = vector.load %arg10[%c0_1, %c0_2] : memref<1x640xf32, #tpu.memory_space<vmem>>, vector<1x640xf32>
    %2 = tpu.iota {dimensions = array<i32: 0>} : vector<24x640xi32>
    %3 = arith.sitofp %2 : vector<24x640xi32> to vector<24x640xf32>
    %4 = tpu.iota {dimensions = array<i32: 0>} : vector<24x640xi32>
    %5 = arith.sitofp %4 : vector<24x640xi32> to vector<24x640xf32>
    %c0_3 = arith.constant 0 : index
    %c0_4 = arith.constant 0 : index
    %c0_5 = arith.constant 0 : index
    %6 = vector.load %arg1[%c0_3, %c0_4, %c0_5] : memref<1x18x672xf32, #tpu.memory_space<vmem>>, vector<1x18x672xf32>
    %7 = vector.shape_cast %6 : vector<1x18x672xf32> to vector<18x672xf32>
    %c0_6 = arith.constant 0 : index
    %c0_7 = arith.constant 0 : index
    %8 = vector.load %arg3[%c0_6, %c0_7] : memref<672x36xf32, #tpu.memory_space<vmem>>, vector<672x36xf32>
    %cst = arith.constant dense<0.000000e+00> : vector<18x36xf32>
    %9 = tpu.matmul %7, %8, %cst {dimension_numbers = #tpu.dot_dimension_numbers<[1], [0], [0], [1], [0, 0, 1, 1], [], []>} : vector<18x672xf32>, vector<672x36xf32>, vector<18x36xf32> -> vector<18x36xf32>
    %10 = vector.extract_strided_slice %9 {offsets = [0, 0], sizes = [9, 18], strides = [1, 1]} : vector<18x36xf32> to vector<9x18xf32>
    %11 = vector.extract_strided_slice %9 {offsets = [0, 18], sizes = [9, 18], strides = [1, 1]} : vector<18x36xf32> to vector<9x18xf32>
    %12 = arith.maximumf %10, %11 : vector<9x18xf32>
    %13 = vector.extract_strided_slice %9 {offsets = [9, 0], sizes = [9, 18], strides = [1, 1]} : vector<18x36xf32> to vector<9x18xf32>
    %14 = vector.extract_strided_slice %9 {offsets = [9, 18], sizes = [9, 18], strides = [1, 1]} : vector<18x36xf32> to vector<9x18xf32>
    %15 = arith.maximumf %13, %14 : vector<9x18xf32>
    %16 = arith.maximumf %12, %15 : vector<9x18xf32>
    %c0_8 = arith.constant 0 : index
    %c0_9 = arith.constant 0 : index
    %17 = vector.load %arg4[%c0_8, %c0_9] : memref<1x18xf32, #tpu.memory_space<vmem>>, vector<1x18xf32>
    %18 = vector.broadcast %17 : vector<1x18xf32> to vector<9x18xf32>
    %19 = arith.addf %16, %18 : vector<9x18xf32>
    %cst_10 = arith.constant 0.000000e+00 : f32
    %20 = vector.broadcast %cst_10 : f32 to vector<9x18xf32>
    %21 = arith.maximumf %19, %20 : vector<9x18xf32>
    %c0_11 = arith.constant 0 : index
    %c0_12 = arith.constant 0 : index
    %22 = vector.load %arg5[%c0_11, %c0_12] : memref<18x640xf32, #tpu.memory_space<vmem>>, vector<18x640xf32>
    %cst_13 = arith.constant dense<0.000000e+00> : vector<9x640xf32>
    %23 = tpu.matmul %21, %22, %cst_13 {dimension_numbers = #tpu.dot_dimension_numbers<[1], [0], [0], [1], [0, 0, 1, 1], [], []>} : vector<9x18xf32>, vector<18x640xf32>, vector<9x640xf32> -> vector<9x640xf32>
    %c0_14 = arith.constant 0 : index
    %c0_15 = arith.constant 0 : index
    %24 = vector.load %arg6[%c0_14, %c0_15] : memref<1x128xf32, #tpu.memory_space<vmem>>, vector<1x128xf32>
    %25 = vector.extract_strided_slice %23 {offsets = [0, 0], sizes = [4, 128], strides = [1, 1]} : vector<9x640xf32> to vector<4x128xf32>
    %26 = vector.broadcast %24 : vector<1x128xf32> to vector<4x128xf32>
    %27 = arith.addf %26, %25 : vector<4x128xf32>
    %28 = vector.extract_strided_slice %23 {offsets = [1, 128], sizes = [4, 128], strides = [1, 1]} : vector<9x640xf32> to vector<4x128xf32>
    %29 = arith.addf %27, %28 : vector<4x128xf32>
    %30 = vector.extract_strided_slice %23 {offsets = [2, 256], sizes = [4, 128], strides = [1, 1]} : vector<9x640xf32> to vector<4x128xf32>
    %31 = arith.addf %29, %30 : vector<4x128xf32>
    %32 = vector.extract_strided_slice %23 {offsets = [3, 384], sizes = [4, 128], strides = [1, 1]} : vector<9x640xf32> to vector<4x128xf32>
    %33 = arith.addf %31, %32 : vector<4x128xf32>
    %34 = vector.extract_strided_slice %23 {offsets = [4, 512], sizes = [4, 128], strides = [1, 1]} : vector<9x640xf32> to vector<4x128xf32>
    %35 = arith.addf %33, %34 : vector<4x128xf32>
    %36 = vector.extract_strided_slice %35 {offsets = [0, 0], sizes = [4, 20], strides = [1, 1]} : vector<4x128xf32> to vector<4x20xf32>
    %37 = vector.extract_strided_slice %35 {offsets = [0, 20], sizes = [4, 20], strides = [1, 1]} : vector<4x128xf32> to vector<4x20xf32>
    %38 = arith.maximumf %36, %37 : vector<4x20xf32>
    %cst_16 = arith.constant 0.000000e+00 : f32
    %39 = vector.broadcast %cst_16 : f32 to vector<1x20xf32>
    %40 = vector.extract_strided_slice %38 {offsets = [0, 0], sizes = [1, 20], strides = [1, 1]} : vector<4x20xf32> to vector<1x20xf32>
    %41 = vector.extract_strided_slice %38 {offsets = [1, 0], sizes = [1, 20], strides = [1, 1]} : vector<4x20xf32> to vector<1x20xf32>
    %42 = arith.maximumf %40, %41 : vector<1x20xf32>
    %cst_17 = arith.constant 0.000000e+00 : f32
    %43 = vector.broadcast %cst_17 : f32 to vector<1x20xf32>
    %44 = arith.maximumf %42, %43 : vector<1x20xf32>
    %45 = arith.addf %39, %44 : vector<1x20xf32>
    %46 = vector.extract_strided_slice %38 {offsets = [2, 0], sizes = [1, 20], strides = [1, 1]} : vector<4x20xf32> to vector<1x20xf32>
    %47 = vector.extract_strided_slice %38 {offsets = [3, 0], sizes = [1, 20], strides = [1, 1]} : vector<4x20xf32> to vector<1x20xf32>
    %48 = arith.maximumf %46, %47 : vector<1x20xf32>
    %cst_18 = arith.constant 0.000000e+00 : f32
    %49 = vector.broadcast %cst_18 : f32 to vector<1x20xf32>
    %50 = arith.maximumf %48, %49 : vector<1x20xf32>
    %51 = arith.addf %45, %50 : vector<1x20xf32>
    %cst_19 = arith.constant 0.000000e+00 : f32
    %52 = vector.broadcast %cst_19 : f32 to vector<1x10xf32>
    %53 = vector.extract_strided_slice %51 {offsets = [0, 0], sizes = [1, 10], strides = [1, 1]} : vector<1x20xf32> to vector<1x10xf32>
    %54 = arith.addf %52, %53 : vector<1x10xf32>
    %55 = vector.extract_strided_slice %51 {offsets = [0, 10], sizes = [1, 10], strides = [1, 1]} : vector<1x20xf32> to vector<1x10xf32>
    %56 = arith.addf %54, %55 : vector<1x10xf32>
    %cst_20 = arith.constant 2.500000e-01 : f32
    %57 = vector.broadcast %cst_20 : f32 to vector<1x10xf32>
    %58 = arith.mulf %56, %57 : vector<1x10xf32>
    %c0_21 = arith.constant 0 : index
    %c0_22 = arith.constant 0 : index
    %59 = vector.load %arg7[%c0_21, %c0_22] : memref<10x6xf32, #tpu.memory_space<vmem>>, vector<10x6xf32>
    %cst_23 = arith.constant dense<0.000000e+00> : vector<1x6xf32>
    %60 = tpu.matmul %58, %59, %cst_23 {dimension_numbers = #tpu.dot_dimension_numbers<[1], [0], [0], [1], [0, 0, 1, 1], [], []>} : vector<1x10xf32>, vector<10x6xf32>, vector<1x6xf32> -> vector<1x6xf32>
    %c0_24 = arith.constant 0 : index
    %c0_25 = arith.constant 0 : index
    %61 = vector.load %arg8[%c0_24, %c0_25] : memref<1x6xf32, #tpu.memory_space<vmem>>, vector<1x6xf32>
    %62 = arith.addf %60, %61 : vector<1x6xf32>
    %63 = vector.extract_strided_slice %62 {offsets = [0, 0], sizes = [1, 1], strides = [1, 1]} : vector<1x6xf32> to vector<1x1xf32>
    %64 = vector.extract_strided_slice %62 {offsets = [0, 1], sizes = [1, 1], strides = [1, 1]} : vector<1x6xf32> to vector<1x1xf32>
    %65 = vector.extract_strided_slice %62 {offsets = [0, 2], sizes = [1, 1], strides = [1, 1]} : vector<1x6xf32> to vector<1x1xf32>
    %66 = vector.extract_strided_slice %62 {offsets = [0, 3], sizes = [1, 1], strides = [1, 1]} : vector<1x6xf32> to vector<1x1xf32>
    %67 = vector.extract_strided_slice %62 {offsets = [0, 4], sizes = [1, 1], strides = [1, 1]} : vector<1x6xf32> to vector<1x1xf32>
    %68 = vector.extract_strided_slice %62 {offsets = [0, 5], sizes = [1, 1], strides = [1, 1]} : vector<1x6xf32> to vector<1x1xf32>
    %69 = vector.broadcast %63 : vector<1x1xf32> to vector<1x640xf32>
    %70 = arith.mulf %69, %0 : vector<1x640xf32>
    %71 = vector.broadcast %64 : vector<1x1xf32> to vector<1x640xf32>
    %72 = arith.mulf %71, %1 : vector<1x640xf32>
    %73 = arith.addf %70, %72 : vector<1x640xf32>
    %74 = vector.broadcast %65 : vector<1x1xf32> to vector<1x640xf32>
    %75 = arith.addf %73, %74 : vector<1x640xf32>
    %76 = vector.broadcast %66 : vector<1x1xf32> to vector<1x640xf32>
    %77 = arith.mulf %76, %0 : vector<1x640xf32>
    %78 = vector.broadcast %67 : vector<1x1xf32> to vector<1x640xf32>
    %79 = arith.mulf %78, %1 : vector<1x640xf32>
    %80 = arith.addf %77, %79 : vector<1x640xf32>
    %81 = vector.broadcast %68 : vector<1x1xf32> to vector<1x640xf32>
    %82 = arith.addf %80, %81 : vector<1x640xf32>
    %cst_26 = arith.constant 1.000000e+00 : f32
    %83 = vector.broadcast %cst_26 : f32 to vector<1x640xf32>
    %84 = arith.addf %75, %83 : vector<1x640xf32>
    %cst_27 = arith.constant 2.400000e+01 : f32
    %85 = vector.broadcast %cst_27 : f32 to vector<1x640xf32>
    %86 = arith.mulf %84, %85 : vector<1x640xf32>
    %cst_28 = arith.constant 1.000000e+00 : f32
    %87 = vector.broadcast %cst_28 : f32 to vector<1x640xf32>
    %88 = arith.subf %86, %87 : vector<1x640xf32>
    %cst_29 = arith.constant 5.000000e-01 : f32
    %89 = vector.broadcast %cst_29 : f32 to vector<1x640xf32>
    %90 = arith.mulf %88, %89 : vector<1x640xf32>
    %cst_30 = arith.constant 1.000000e+00 : f32
    %91 = vector.broadcast %cst_30 : f32 to vector<1x640xf32>
    %92 = arith.addf %82, %91 : vector<1x640xf32>
    %cst_31 = arith.constant 2.400000e+01 : f32
    %93 = vector.broadcast %cst_31 : f32 to vector<1x640xf32>
    %94 = arith.mulf %92, %93 : vector<1x640xf32>
    %cst_32 = arith.constant 1.000000e+00 : f32
    %95 = vector.broadcast %cst_32 : f32 to vector<1x640xf32>
    %96 = arith.subf %94, %95 : vector<1x640xf32>
    %cst_33 = arith.constant 5.000000e-01 : f32
    %97 = vector.broadcast %cst_33 : f32 to vector<1x640xf32>
    %98 = arith.mulf %96, %97 : vector<1x640xf32>
    %99 = math.floor %90 : vector<1x640xf32>
    %100 = math.floor %98 : vector<1x640xf32>
    %101 = arith.subf %90, %99 : vector<1x640xf32>
    %cst_34 = arith.constant 1.000000e+00 : f32
    %102 = vector.broadcast %cst_34 : f32 to vector<1x640xf32>
    %103 = arith.subf %102, %101 : vector<1x640xf32>
    %104 = arith.subf %98, %100 : vector<1x640xf32>
    %cst_35 = arith.constant 1.000000e+00 : f32
    %105 = vector.broadcast %cst_35 : f32 to vector<1x640xf32>
    %106 = arith.subf %105, %104 : vector<1x640xf32>
    %107 = vector.broadcast %99 : vector<1x640xf32> to vector<24x640xf32>
    %108 = arith.cmpf oeq, %3, %107 : vector<24x640xf32>
    %cst_36 = arith.constant 0.000000e+00 : f32
    %109 = vector.shape_cast %103 : vector<1x640xf32> to vector<1x640xf32>
    %110 = vector.broadcast %109 : vector<1x640xf32> to vector<24x640xf32>
    %111 = vector.broadcast %cst_36 : f32 to vector<24x640xf32>
    %112 = arith.select %108, %110, %111 : vector<24x640xi1>, vector<24x640xf32>
    %cst_37 = arith.constant 1.000000e+00 : f32
    %113 = vector.broadcast %cst_37 : f32 to vector<1x640xf32>
    %114 = arith.addf %99, %113 : vector<1x640xf32>
    %115 = vector.broadcast %114 : vector<1x640xf32> to vector<24x640xf32>
    %116 = arith.cmpf oeq, %3, %115 : vector<24x640xf32>
    %cst_38 = arith.constant 0.000000e+00 : f32
    %117 = vector.shape_cast %101 : vector<1x640xf32> to vector<1x640xf32>
    %118 = vector.broadcast %117 : vector<1x640xf32> to vector<24x640xf32>
    %119 = vector.broadcast %cst_38 : f32 to vector<24x640xf32>
    %120 = arith.select %116, %118, %119 : vector<24x640xi1>, vector<24x640xf32>
    %121 = arith.addf %112, %120 : vector<24x640xf32>
    %122 = vector.broadcast %100 : vector<1x640xf32> to vector<24x640xf32>
    %123 = arith.cmpf oeq, %5, %122 : vector<24x640xf32>
    %cst_39 = arith.constant 0.000000e+00 : f32
    %124 = vector.shape_cast %106 : vector<1x640xf32> to vector<1x640xf32>
    %125 = vector.broadcast %124 : vector<1x640xf32> to vector<24x640xf32>
    %126 = vector.broadcast %cst_39 : f32 to vector<24x640xf32>
    %127 = arith.select %123, %125, %126 : vector<24x640xi1>, vector<24x640xf32>
    %cst_40 = arith.constant 1.000000e+00 : f32
    %128 = vector.broadcast %cst_40 : f32 to vector<1x640xf32>
    %129 = arith.addf %100, %128 : vector<1x640xf32>
    %130 = vector.broadcast %129 : vector<1x640xf32> to vector<24x640xf32>
    %131 = arith.cmpf oeq, %5, %130 : vector<24x640xf32>
    %cst_41 = arith.constant 0.000000e+00 : f32
    %132 = vector.shape_cast %104 : vector<1x640xf32> to vector<1x640xf32>
    %133 = vector.broadcast %132 : vector<1x640xf32> to vector<24x640xf32>
    %134 = vector.broadcast %cst_41 : f32 to vector<24x640xf32>
    %135 = arith.select %131, %133, %134 : vector<24x640xi1>, vector<24x640xf32>
    %136 = arith.addf %127, %135 : vector<24x640xf32>
    %c0_42 = arith.constant 0 : index
    %c0_43 = arith.constant 0 : index
    %c0_44 = arith.constant 0 : index
    %137 = vector.load %arg2[%c0_42, %c0_43, %c0_44] : memref<1x96x24xf32, #tpu.memory_space<vmem>>, vector<1x96x24xf32>
    %138 = vector.shape_cast %137 : vector<1x96x24xf32> to vector<96x24xf32>
    %cst_45 = arith.constant dense<0.000000e+00> : vector<96x640xf32>
    %139 = tpu.matmul %138, %121, %cst_45 {dimension_numbers = #tpu.dot_dimension_numbers<[1], [0], [0], [1], [0, 0, 1, 1], [], []>} : vector<96x24xf32>, vector<24x640xf32>, vector<96x640xf32> -> vector<96x640xf32>
    %140 = vector.extract_strided_slice %139 {offsets = [0, 0], sizes = [24, 640], strides = [1, 1]} : vector<96x640xf32> to vector<24x640xf32>
    %141 = arith.mulf %140, %136 : vector<24x640xf32>
    %cst_46 = arith.constant dense<0.000000e+00> : vector<640xf32>
    %142 = vector.multi_reduction <add>, %141, %cst_46 [0] : vector<24x640xf32> to vector<640xf32>
    %143 = vector.shape_cast %142 : vector<640xf32> to vector<1x640xf32>
    %144 = vector.extract_strided_slice %139 {offsets = [24, 0], sizes = [24, 640], strides = [1, 1]} : vector<96x640xf32> to vector<24x640xf32>
    %145 = arith.mulf %144, %136 : vector<24x640xf32>
    %cst_47 = arith.constant dense<0.000000e+00> : vector<640xf32>
    %146 = vector.multi_reduction <add>, %145, %cst_47 [0] : vector<24x640xf32> to vector<640xf32>
    %147 = vector.shape_cast %146 : vector<640xf32> to vector<1x640xf32>
    %148 = vector.extract_strided_slice %139 {offsets = [48, 0], sizes = [24, 640], strides = [1, 1]} : vector<96x640xf32> to vector<24x640xf32>
    %149 = arith.mulf %148, %136 : vector<24x640xf32>
    %cst_48 = arith.constant dense<0.000000e+00> : vector<640xf32>
    %150 = vector.multi_reduction <add>, %149, %cst_48 [0] : vector<24x640xf32> to vector<640xf32>
    %151 = vector.shape_cast %150 : vector<640xf32> to vector<1x640xf32>
    %152 = vector.extract_strided_slice %139 {offsets = [72, 0], sizes = [24, 640], strides = [1, 1]} : vector<96x640xf32> to vector<24x640xf32>
    %153 = arith.mulf %152, %136 : vector<24x640xf32>
    %cst_49 = arith.constant dense<0.000000e+00> : vector<640xf32>
    %154 = vector.multi_reduction <add>, %153, %cst_49 [0] : vector<24x640xf32> to vector<640xf32>
    %155 = vector.shape_cast %154 : vector<640xf32> to vector<1x640xf32>
    %156 = tpu.concatenate %143, %147, %151, %155 in 0 : vector<1x640xf32>, vector<1x640xf32>, vector<1x640xf32>, vector<1x640xf32> -> vector<4x640xf32>
    %c0_50 = arith.constant 0 : index
    %c0_51 = arith.constant 0 : index
    %c0_52 = arith.constant 0 : index
    %157 = vector.load %arg11[%c0_50, %c0_51, %c0_52] : memref<1x4x640xf32, #tpu.memory_space<vmem>>, vector<1x4x640xf32>
    %158 = vector.shape_cast %157 : vector<1x4x640xf32> to vector<4x640xf32>
    %159 = vector.shape_cast %156 : vector<4x640xf32> to vector<1x4x640xf32>
    tpu.vector_store %arg11[%c0_50, %c0_51, %c0_52], %159 {strides = array<i32>} : memref<1x4x640xf32, #tpu.memory_space<vmem>>, vector<1x4x640xf32>,
    return
  }
  func.func @transform_0(%arg0: i32) -> (i32, i32, i32) {
    %c0_i32 = arith.constant 0 : i32
    %c0_i32_0 = arith.constant 0 : i32
    %c0_i32_1 = arith.constant 0 : i32
    return %arg0, %c0_i32, %c0_i32_0 : i32, i32, i32
  }
  func.func @transform_1(%arg0: i32) -> (i32, i32, i32) {
    %c0_i32 = arith.constant 0 : i32
    %c0_i32_0 = arith.constant 0 : i32
    %c0_i32_1 = arith.constant 0 : i32
    return %arg0, %c0_i32, %c0_i32_0 : i32, i32, i32
  }
  func.func @transform_2(%arg0: i32) -> (i32, i32) {
    %c0_i32 = arith.constant 0 : i32
    %c0_i32_0 = arith.constant 0 : i32
    %c0_i32_1 = arith.constant 0 : i32
    return %c0_i32, %c0_i32_0 : i32, i32
  }
  func.func @transform_3(%arg0: i32) -> (i32, i32) {
    %c0_i32 = arith.constant 0 : i32
    %c0_i32_0 = arith.constant 0 : i32
    %c0_i32_1 = arith.constant 0 : i32
    return %c0_i32, %c0_i32_0 : i32, i32
  }
  func.func @transform_4(%arg0: i32) -> (i32, i32) {
    %c0_i32 = arith.constant 0 : i32
    %c0_i32_0 = arith.constant 0 : i32
    %c0_i32_1 = arith.constant 0 : i32
    return %c0_i32, %c0_i32_0 : i32, i32
  }
  func.func @transform_5(%arg0: i32) -> (i32, i32) {
    %c0_i32 = arith.constant 0 : i32
    %c0_i32_0 = arith.constant 0 : i32
    %c0_i32_1 = arith.constant 0 : i32
    return %c0_i32, %c0_i32_0 : i32, i32
  }
  func.func @transform_6(%arg0: i32) -> (i32, i32) {
    %c0_i32 = arith.constant 0 : i32
    %c0_i32_0 = arith.constant 0 : i32
    %c0_i32_1 = arith.constant 0 : i32
    return %c0_i32, %c0_i32_0 : i32, i32
  }
  func.func @transform_7(%arg0: i32) -> (i32, i32) {
    %c0_i32 = arith.constant 0 : i32
    %c0_i32_0 = arith.constant 0 : i32
    %c0_i32_1 = arith.constant 0 : i32
    return %c0_i32, %c0_i32_0 : i32, i32
  }
  func.func @transform_8(%arg0: i32) -> (i32, i32) {
    %c0_i32 = arith.constant 0 : i32
    %c0_i32_0 = arith.constant 0 : i32
    %c0_i32_1 = arith.constant 0 : i32
    return %c0_i32, %c0_i32_0 : i32, i32
  }
  func.func @transform_9(%arg0: i32) -> (i32, i32) {
    %c0_i32 = arith.constant 0 : i32
    %c0_i32_0 = arith.constant 0 : i32
    %c0_i32_1 = arith.constant 0 : i32
    return %c0_i32, %c0_i32_0 : i32, i32
  }
  func.func @transform_10(%arg0: i32) -> (i32, i32, i32) {
    %c0_i32 = arith.constant 0 : i32
    %c0_i32_0 = arith.constant 0 : i32
    %c0_i32_1 = arith.constant 0 : i32
    return %arg0, %c0_i32, %c0_i32_0 : i32, i32, i32
  }
}

</mosaic_0001>

<bundles_post_ra>
// kernel: stn_forward.1
= control target key start
LH: loop header
LB: loop body
LE: loop exit
PB: predicated region body
PF: predicated region fallthrough
CT: control target
= control target key end

     0   :  { %s2883_s13 = smov 0   ;;  %s3806_s0 = inlined_call_operand.vmem [shape: f32[2,18,672], index: 0, kind: input, shape index: {}]   ;;  %s3807_s1 = inlined_call_operand.vmem [shape: f32[2,96,24], index: 1, kind: input, shape index: {}]   ;;  %s3808_s2 = inlined_call_operand.vmem [shape: f32[672,36], index: 2, kind: input, shape index: {}]   ;;  %s3809_s3 = inlined_call_operand.vmem [shape: f32[1,18], index: 3, kind: input, shape index: {}]   ;;  %s3810_s4 = inlined_call_operand.vmem [shape: f32[18,640], index: 4, kind: input, shape index: {}]   ;;  %s3811_s5 = inlined_call_operand.vmem [shape: f32[1,128], index: 5, kind: input, shape index: {}]   ;;  %s3812_s6 = inlined_call_operand.vmem [shape: f32[10,6], index: 6, kind: input, shape index: {}]   ;;  %s3813_s7 = inlined_call_operand.vmem [shape: f32[1,6], index: 7, kind: input, shape index: {}]   ;;  %s3814_s8 = inlined_call_operand.vmem [shape: f32[1,640], index: 8, kind: input, shape index: {}]   ;;  %s3815_s9 = inlined_call_operand.vmem [shape: f32[1,640], index: 9, kind: input, shape index: {}]   ;;  %s3816_s10 = inlined_call_operand.vmem [shape: f32[2,4,640], index: 10, kind: output, shape index: {}]  }
   0x1 LB: > { %s2435_s14 = sadd.s32 4294967295, %s2813_s13   ;;  %p2439_p0 = scmp.ge.s32.totalorder %s2813_s13, 1  ;;  %s2813_s13 = sphi %s2883_s13, %s20_s13  }
   0x2   : > { %p322_p1 = scmp.lt.s32.totalorder %s2813_s13, 3 }
   0x4   : > { %p323_p2 = pnand %p2439_p0, %p322_p1 }
   0x5   : > { %v423_v0 = vld [vmem:[%s3808_s2 + $0x80] sm:$0xff] (!%p323_p2)  ;;  %v424_v1 = vld [vmem:[%s3808_s2 + $0x88] sm:$0xff] (!%p323_p2)  ;;  %v425_v11 = vld [vmem:[%s3808_s2 + $0x90] sm:$0xff] (!%p323_p2)  ;;  %p2956_p3 = scmp.lt.s32.totalorder (!%p323_p2), %s2435_s14, 1  ;;  %vm491_vm0 = vcmask (!%p323_p2), 261120   ;;  %s2816_s22 = smov (!%p323_p2), 110  }
   0x6   : > { %326 = sbr.rel (%p323_p2) target bundleno = 1602 (0x642), region = 60  ;;  %v455_v2 = vld [vmem:[%s3808_s2 + $0x180] sm:$0xff] (!%p323_p2)  ;;  %v2654_v3 = vpack.c.bf16 (!%p323_p2), %v424_v1, %v423_v0  ;;  %v456_v4 = vld [vmem:[%s3808_s2 + $0x188] sm:$0xff] (!%p323_p2)  ;;  %v426_v13 = vld [vmem:[%s3808_s2 + $0x98] sm:$0xff] (!%p323_p2)  ;;  %vm799_vm1 = vcmask (!%p323_p2), 1041408   ;;  %vm758_vm2 = vcmask (!%p323_p2), 1046528  }
   0x7   : > { %v407_v5 = vld [vmem:[%s3808_s2] sm:$0xff] (!%p323_p2)  ;;  %v408_v6 = vld [vmem:[%s3808_s2 + $0x8] sm:$0xff] (!%p323_p2)  ;;  %v2686_v7 = vpack.c.bf16 (!%p323_p2), %v456_v4, %v455_v2  ;;  %v457_v14 = vld [vmem:[%s3808_s2 + $0x190] sm:$0xff] (!%p323_p2)  ;;  %v2658_v16 = vpack.c.bf16 (!%p323_p2), %v426_v13, %v425_v11  ;;  %vm792_vm3 = vcmask (!%p323_p2), 146432   ;;  %s2818_s16 = smov (!%p323_p2), 108   ;;  %vm2819_vm4 = vmmov (!%p323_p2), 1  }
   0x8   : > { %v2656_v8 = vpack.c.bf16 (!%p323_p2), %v408_v6, %v407_v5  ;;  %v439_v9 = vld [vmem:[%s3808_s2 + $0x100] sm:$0xff] (!%p323_p2)  ;;  %v440_v10 = vld [vmem:[%s3808_s2 + $0x108] sm:$0xff] (!%p323_p2)  ;;  %2655 = vmatprep.subr.bf16.mxu0 (!%p323_p2), %v2654_v3  ;;  %v458_v15 = vld [vmem:[%s3808_s2 + $0x198] sm:$0xff] (!%p323_p2)  ;;  %vm2820_vm6 = vmmov (!%p323_p2), 0   ;;  %s2821_s21 = smov (!%p323_p2), 118   ;;  %vm1088_vm7 = vcmask (!%p323_p2), 80896  }
   0x9   : > { %v2688_v12 = vpack.c.bf16 (!%p323_p2), %v440_v10, %v439_v9  ;;  %2687 = vmatprep.subr.bf16.mxu1 (!%p323_p2), %v2686_v7  ;;  %v2690_v17 = vpack.c.bf16 (!%p323_p2), %v458_v15, %v457_v14  ;;  %v409_v18 = vld [vmem:[%s3808_s2 + $0x10] sm:$0xff] (!%p323_p2)  ;;  %v410_v19 = vld [vmem:[%s3808_s2 + $0x18] sm:$0xff] (!%p323_p2)  ;;  %v427_v23 = vld [vmem:[%s3808_s2 + $0xa0] sm:$0xff] (!%p323_p2) }
   0xa   : > { %2657 = vmatpush3.bf16.msra.mxu0 (!%p323_p2), %v2656_v8  ;;  %v441_v20 = vld [vmem:[%s3808_s2 + $0x110] sm:$0xff] (!%p323_p2)  ;;  %v2660_v21 = vpack.c.bf16 (!%p323_p2), %v410_v19, %v409_v18  ;;  %v442_v22 = vld [vmem:[%s3808_s2 + $0x118] sm:$0xff] (!%p323_p2)  ;;  %v428_v24 = vld [vmem:[%s3808_s2 + $0xa8] sm:$0xff] (!%p323_p2) }
   0xb   : > { %2689 = vmatpush3.bf16.msra.mxu1 (!%p323_p2), %v2688_v12  ;;  %2659 = vmatprep.subr.bf16.mxu0 (!%p323_p2), %v2658_v16  ;;  %v2692_v25 = vpack.c.bf16 (!%p323_p2), %v442_v22, %v441_v20  ;;  %v2662_v26 = vpack.c.bf16 (!%p323_p2), %v428_v24, %v427_v23  ;;  %v459_v27 = vld [vmem:[%s3808_s2 + $0x1a0] sm:$0xff] (!%p323_p2)  ;;  %v460_v28 = vld [vmem:[%s3808_s2 + $0x1a8] sm:$0xff] (!%p323_p2)  ;;  %v429_v35 = vld [vmem:[%s3808_s2 + $0xb0] sm:$0xff] (!%p323_p2) }
   0xc   : > { %2691 = vmatprep.subr.bf16.mxu1 (!%p323_p2), %v2690_v17  ;;  %v411_v29 = vld [vmem:[%s3808_s2 + $0x20] sm:$0xff] (!%p323_p2)  ;;  %v2694_v30 = vpack.c.bf16 (!%p323_p2), %v460_v28, %v459_v27  ;;  %v412_v31 = vld [vmem:[%s3808_s2 + $0x28] sm:$0xff] (!%p323_p2)  ;;  %v430_v36 = vld [vmem:[%s3808_s2 + $0xb8] sm:$0xff] (!%p323_p2) }
   0xd   : > { %v443_v32 = vld [vmem:[%s3808_s2 + $0x120] sm:$0xff]  ;;  %v444_v33 = vld [vmem:[%s3808_s2 + $0x128] sm:$0xff]  ;;  %v2664_v34 = vpack.c.bf16 %v412_v31, %v411_v29  ;;  %v461_v37 = vld [vmem:[%s3808_s2 + $0x1b0] sm:$0xff]  ;;  %v2666_v39 = vpack.c.bf16 %v430_v36, %v429_v35  ;;  %s3819_s14 = smov (!%p2956_p3, %s2435_s14), 1 }
   0xe   : > { %2661 = vmatpush3.bf16.msra.mxu0 %v2660_v21  ;;  %v2696_v38 = vpack.c.bf16 %v444_v33, %v443_v32  ;;  %v462_v40 = vld [vmem:[%s3808_s2 + $0x1b8] sm:$0xff]  ;;  %v413_v41 = vld [vmem:[%s3808_s2 + $0x30] sm:$0xff]  ;;  %v431_v46 = vld [vmem:[%s3808_s2 + $0xc0] sm:$0xff]  ;;  %s2776_s29 = smul.u32 144, %s3819_s14 }
   0xf   : > { %2693 = vmatpush3.bf16.msra.mxu1 %v2692_v25  ;;  %2663 = vmatprep.subr.bf16.mxu0 %v2662_v26  ;;  %v414_v42 = vld [vmem:[%s3808_s2 + $0x38] sm:$0xff]  ;;  %v2698_v43 = vpack.c.bf16 %v462_v40, %v461_v37  ;;  %v445_v44 = vld [vmem:[%s3808_s2 + $0x130] sm:$0xff]  ;;  %v432_v47 = vld [vmem:[%s3808_s2 + $0xc8] sm:$0xff]  ;;  %s2777_s23 = smul.u32 96, %s3819_s14 }
  0x10   : > { %2695 = vmatprep.subr.bf16.mxu1 %v2694_v30  ;;  %v446_v45 = vld [vmem:[%s3808_s2 + $0x138] sm:$0xff]  ;;  %v463_v48 = vld [vmem:[%s3808_s2 + $0x1c0] sm:$0xff]  ;;  %v464_v49 = vld [vmem:[%s3808_s2 + $0x1c8] sm:$0xff]  ;;  %v2668_v50 = vpack.c.bf16 %v414_v42, %v413_v41  ;;  %v2670_v52 = vpack.c.bf16 %v432_v47, %v431_v46  ;;  %s3057_s11 = scalar_lea.vmem %s3806_s0, %s2776_s29  ;;  %s2778_s27 = smul.u32 20, %s3819_s14 }
  0x11   : > { %v2700_v51 = vpack.c.bf16 %v446_v45, %v445_v44  ;;  %v415_v53 = vld [vmem:[%s3808_s2 + $0x40] sm:$0xff]  ;;  %v416_v54 = vld [vmem:[%s3808_s2 + $0x48] sm:$0xff]  ;;  %v2702_v56 = vpack.c.bf16 %v464_v49, %v463_v48  ;;  %v433_v58 = vld [vmem:[%s3808_s2 + $0xd0] sm:$0xff]  ;;  %s3458_s26 = scalar_lea.vmem %s3807_s1, %s2777_s23 }
  0x12   : > { %2665 = vmatpush3.bf16.msra.mxu0 %v2664_v34  ;;  %v447_v55 = vld [vmem:[%s3808_s2 + $0x140] sm:$0xff]  ;;  %v448_v57 = vld [vmem:[%s3808_s2 + $0x148] sm:$0xff]  ;;  %v434_v59 = vld [vmem:[%s3808_s2 + $0xd8] sm:$0xff]  ;;  %v2672_v62 = vpack.c.bf16 %v416_v54, %v415_v53  ;;  %s3787_s14 = scalar_lea.vmem %s3816_s10, %s2778_s27 }
  0x13   : > { %2697 = vmatpush3.bf16.msra.mxu1 %v2696_v38  ;;  %2667 = vmatprep.subr.bf16.mxu0 %v2666_v39  ;;  %v465_v60 = vld [vmem:[%s3808_s2 + $0x1d0] sm:$0xff]  ;;  %v466_v61 = vld [vmem:[%s3808_s2 + $0x1d8] sm:$0xff]  ;;  %v2704_v63 = vpack.c.bf16 %v448_v57, %v447_v55  ;;  %v2674_v0 = vpack.c.bf16 %v434_v59, %v433_v58  ;;  %v435_v6 = vld [vmem:[%s3808_s2 + $0xe0] sm:$0xff]  ;;  %v2815_v39 = vmov 0.0|0.0  }
  0x14   : > { %2699 = vmatprep.subr.bf16.mxu1 %v2698_v43  ;;  %v417_v1 = vld [vmem:[%s3808_s2 + $0x50] sm:$0xff]  ;;  %v418_v2 = vld [vmem:[%s3808_s2 + $0x58] sm:$0xff]  ;;  %v2706_v4 = vpack.c.bf16 %v466_v61, %v465_v60  ;;  %v436_v7 = vld [vmem:[%s3808_s2 + $0xe8] sm:$0xff] }
  0x15   : > { %v449_v3 = vld [vmem:[%s3808_s2 + $0x150] sm:$0xff]  ;;  %v450_v5 = vld [vmem:[%s3808_s2 + $0x158] sm:$0xff]  ;;  %v467_v8 = vld [vmem:[%s3808_s2 + $0x1e0] sm:$0xff]  ;;  %v2676_v10 = vpack.c.bf16 %v418_v2, %v417_v1  ;;  %v2678_v14 = vpack.c.bf16 %v436_v7, %v435_v6 }
  0x16   : > { %2669 = vmatpush3.bf16.msra.mxu0 %v2668_v50  ;;  %v468_v9 = vld [vmem:[%s3808_s2 + $0x1e8] sm:$0xff]  ;;  %v419_v11 = vld [vmem:[%s3808_s2 + $0x60] sm:$0xff]  ;;  %v2708_v13 = vpack.c.bf16 %v450_v5, %v449_v3  ;;  %v392_v17 = vld [vmem:[%s3057_s11 + $0x18] sm:$0xff] }
  0x17   : > { %2701 = vmatpush3.bf16.msra.mxu1 %v2700_v51  ;;  %2671 = vmatprep.subr.bf16.mxu0 %v2670_v52  ;;  %v420_v12 = vld [vmem:[%s3808_s2 + $0x68] sm:$0xff]  ;;  %v451_v15 = vld [vmem:[%s3808_s2 + $0x160] sm:$0xff]  ;;  %v2710_v18 = vpack.c.bf16 %v468_v9, %v467_v8  ;;  %v437_v20 = vld [vmem:[%s3808_s2 + $0xf0] sm:$0xff] }
  0x18   : > { %2703 = vmatprep.subr.bf16.mxu1 %v2702_v56  ;;  %v390_v16 = vld [vmem:[%s3057_s11 + $0x8] sm:$0xff]  ;;  %v438_v21 = vld [vmem:[%s3808_s2 + $0xf8] sm:$0xff]  ;;  %v469_v22 = vld [vmem:[%s3808_s2 + $0x1f0] sm:$0xff]  ;;  %645 = vmatprep.mubr.f32.mxu1 %v392_v17  ;;  %v2680_v24 = vpack.c.bf16 %v420_v12, %v419_v11 }
  0x19   : > { %v452_v19 = vld [vmem:[%s3808_s2 + $0x168] sm:$0xff]  ;;  %565 = vmatprep.mubr.f32.mxu0 %v390_v16  ;;  %v470_v23 = vld [vmem:[%s3808_s2 + $0x1f8] sm:$0xff]  ;;  %v2682_v26 = vpack.c.bf16 %v438_v21, %v437_v20  ;;  %v421_v27 = vld [vmem:[%s3808_s2 + $0x70] sm:$0xff] }
  0x1a   : > { %2673 = vmatpush3.bf16.msra.mxu0 %v2672_v62  ;;  %v2712_v25 = vpack.c.bf16 %v452_v19, %v451_v15  ;;  %v422_v28 = vld [vmem:[%s3808_s2 + $0x78] sm:$0xff]  ;;  %v2714_v29 = vpack.c.bf16 %v470_v23, %v469_v22  ;;  %v453_v30 = vld [vmem:[%s3808_s2 + $0x170] sm:$0xff]  ;;  %v471_v34 = vld [vmem:[%s3808_s2 + $0x200] sm:$0xff] }
  0x1b   : > { %2705 = vmatpush3.bf16.msra.mxu1 %v2704_v63  ;;  %2675 = vmatprep.subr.bf16.mxu0 %v2674_v0  ;;  %v454_v31 = vld [vmem:[%s3808_s2 + $0x178] sm:$0xff]  ;;  %v2684_v32 = vpack.c.bf16 %v422_v28, %v421_v27  ;;  %v472_v35 = vld [vmem:[%s3808_s2 + $0x208] sm:$0xff]  ;;  %v389_v36 = vld [vmem:[%s3057_s11] sm:$0xff] }
  0x1c   : > { %2707 = vmatprep.subr.bf16.mxu1 %v2706_v4  ;;  %v2716_v33 = vpack.c.bf16 %v454_v31, %v453_v30  ;;  %v2719_v37 = vpack.c.bf16 %v472_v35, %v471_v34  ;;  %v391_v38 = vld [vmem:[%s3057_s11 + $0x10] sm:$0xff]  ;;  %v474_v41 = vld [vmem:[%s3808_s2 + $0x218] sm:$0xff]  ;;  %v398_v43 = vld [vmem:[%s3057_s11 + $0x48] sm:$0xff] }
  0x1d   : > { %v473_v40 = vld [vmem:[%s3808_s2 + $0x210] sm:$0xff]  ;;  %v396_v42 = vld [vmem:[%s3057_s11 + $0x38] sm:$0xff]  ;;  %v475_v46 = vld [vmem:[%s3808_s2 + $0x220] sm:$0xff] }
  0x1e   : > { %2677 = vmatpush3.bf16.msra.mxu0 %v2676_v10  ;;  %v2722_v44 = vpack.c.bf16 %v474_v41, %v473_v40  ;;  %v395_v45 = vld [vmem:[%s3057_s11 + $0x30] sm:$0xff]  ;;  %v476_v47 = vld [vmem:[%s3808_s2 + $0x228] sm:$0xff]  ;;  %v397_v48 = vld [vmem:[%s3057_s11 + $0x40] sm:$0xff] }
  0x1f   : > { %2709 = vmatpush3.bf16.msra.mxu1 %v2708_v13  ;;  %2679 = vmatprep.subr.bf16.mxu0 %v2678_v14  ;;  %v402_v49 = vld [vmem:[%s3057_s11 + $0x68] sm:$0x3]  ;;  %v404_v50 = vld [vmem:[%s3057_s11 + $0x78] sm:$0x3]  ;;  %v2725_v51 = vpack.c.bf16 %v476_v47, %v475_v46  ;;  %v401_v52 = vld [vmem:[%s3057_s11 + $0x60] sm:$0x3] }
  0x20   : > { %2711 = vmatprep.subr.bf16.mxu1 %v2710_v18  ;;  %v477_v53 = vld [vmem:[%s3808_s2 + $0x230] sm:$0xff]  ;;  %v478_v54 = vld [vmem:[%s3808_s2 + $0x238] sm:$0xff]  ;;  %v394_v56 = vld [vmem:[%s3057_s11 + $0x28] sm:$0xff] }
  0x21   : > { %v403_v55 = vld [vmem:[%s3057_s11 + $0x70] sm:$0x3]  ;;  %v2728_v57 = vpack.c.bf16 %v478_v54, %v477_v53  ;;  %v479_v58 = vld [vmem:[%s3808_s2 + $0x240] sm:$0xff]  ;;  %v480_v59 = vld [vmem:[%s3808_s2 + $0x248] sm:$0xff] }
  0x22   : > { %2681 = vmatpush3.bf16.msra.mxu0 %v2680_v24  ;;  %v2731_v60 = vpack.c.bf16 %v480_v59, %v479_v58  ;;  %v481_v61 = vld [vmem:[%s3808_s2 + $0x250] sm:$0xff]  ;;  %v482_v62 = vld [vmem:[%s3808_s2 + $0x258] sm:$0xff]  ;;  %v483_v0 = vld [vmem:[%s3808_s2 + $0x260] sm:$0xff] }
  0x23   : > { %2713 = vmatpush3.bf16.msra.mxu1 %v2712_v25  ;;  %2683 = vmatprep.subr.bf16.mxu0 %v2682_v26  ;;  %v2734_v63 = vpack.c.bf16 %v482_v62, %v481_v61  ;;  %v484_v1 = vld [vmem:[%s3808_s2 + $0x268] sm:$0xff]  ;;  %v485_v3 = vld [vmem:[%s3808_s2 + $0x270] sm:$0xff]  ;;  %v486_v4 = vld [vmem:[%s3808_s2 + $0x278] sm:$0xff] }
  0x24   : > { %2715 = vmatprep.subr.bf16.mxu1 %v2714_v29  ;;  %v2737_v2 = vpack.c.bf16 %v484_v1, %v483_v0  ;;  %v2740_v5 = vpack.c.bf16 %v486_v4, %v485_v3  ;;  %v487_v6 = vld [vmem:[%s3808_s2 + $0x280] sm:$0xff]  ;;  %v488_v7 = vld [vmem:[%s3808_s2 + $0x288] sm:$0xff]  ;;  %v489_v9 = vld [vmem:[%s3808_s2 + $0x290] sm:$0xff] }
  0x25   : > { %v2743_v8 = vpack.c.bf16 %v488_v7, %v487_v6  ;;  %v490_v10 = vld [vmem:[%s3808_s2 + $0x298] sm:$0xff]  ;;  %v393_v12 = vld [vmem:[%s3057_s11 + $0x20] sm:$0xff]  ;;  %v399_v14 = vld [vmem:[%s3057_s11 + $0x50] sm:$0xff] }
  0x26   : > { %2685 = vmatpush3.bf16.msra.mxu0 %v2684_v32  ;;  %v2746_v11 = vpack.c.bf16 %v490_v10, %v489_v9  ;;  %v400_v13 = vld [vmem:[%s3057_s11 + $0x58] sm:$0xff]  ;;  %v406_v15 = vld [vmem:[%s3057_s11 + $0x88] sm:$0x3]  ;;  %v405_v16 = vld [vmem:[%s3057_s11 + $0x80] sm:$0x3] }
  0x27   : > { %2717 = vmatpush3.bf16.msra.mxu1 %v2716_v33  ;;  %2718 = vmatprep.subr.bf16.mxu0 %v2815_v39  ;;  %v783_v40 = vld [vmem:[%s3810_s4 + $0x30] sm:$0xff]  ;;  %v782_v46 = vld [vmem:[%s3810_s4 + $0x28] sm:$0xff]  ;;  %v781_v47 = vld [vmem:[%s3810_s4 + $0x20] sm:$0xff] }
  0x28   : > { %v788_v54 = vld [vmem:[%s3810_s4 + $0x58] sm:$0x3]  ;;  %v791_v58 = vld [vmem:[%s3810_s4 + $0x70] sm:$0x3]  ;;  %v785_v62 = vld [vmem:[%s3810_s4 + $0x40] sm:$0xff] }
  0x29   : > { %566 = vmatmul.mubr.f32.vlgmr.msra.gmra.mrb[0].mxu0 %v389_v36  ;;  %v780_v61 = vld [vmem:[%s3810_s4 + $0x18] sm:$0xff]  ;;  %vm2762_vm5 = vmpackc.low %vm799_vm1, %vm2819_vm4 }
  0x2a   : > { %646 = vmatmul.mubr.f32.vlgmr.msra.gmra.mrb[0].mxu1 %v391_v38  ;;  %2720 = vmatpush1.bf16.msra.mxu0 %v2719_v37  ;;  %v778_v38 = vld [vmem:[%s3810_s4 + $0x8] sm:$0xff] }
  0x2b   : > { %2721 = vmatprep.subr.bf16.mxu0 %v2815_v39  ;;  %570 = vmatprep.mubr.f32.mxu0 %v396_v42  ;;  %v2748_v41 = vpack.c.bf16 %v783_v40, %v778_v38 }
  0x2c   : > { %650 = vmatprep.mubr.f32.mxu1 %v398_v43 }
  0x2d   : > { %571 = vmatmul.mubr.f32.gmra.mrb[2].mxu0 %v395_v45  ;;  %2749 = vmatprep.subr.bf16.mxu1 %v2748_v41  ;;  %v777_v45 = vld [vmem:[%s3810_s4] sm:$0xff] }
  0x2e   : > { %2723 = vmatpush1.bf16.msra.mxu0 %v2722_v44  ;;  %651 = vmatmul.mubr.f32.gmra.mrb[2].mxu1 %v397_v48  ;;  %v2750_v48 = vpack.c.bf16 %v782_v46, %v777_v45  ;;  %v1085_v41 = vld [vmem:[%s3812_s6] sm:$0xff] }
  0x2f   : > { %2724 = vmatprep.subr.bf16.mxu0 %v2815_v39  ;;  %575 = vmatprep.mubr.f32.mxu0 %v402_v49  ;;  %v786_v49 = vld [vmem:[%s3810_s4 + $0x48] sm:$0xff] }
  0x30   : > { %655 = vmatprep.mubr.f32.mxu1 %v404_v50  ;;  %2751 = vmatpush1.bf16.msra.mxu1 %v2750_v48 }
  0x31   : > { %576 = vmatmul.mubr.f32.gmra.mrb[4].mxu0 %v401_v52  ;;  %2447 = vmatprep.subr.msk.mxu1 %vm799_vm1, %v788_v54  ;;  %v2822_v54 = vmov 1  }
  0x32   : > { %2726 = vmatpush1.bf16.msra.mxu0 %v2725_v51  ;;  %656 = vmatmul.mubr.f32.gmra.mrb[4].mxu1 %v403_v55  ;;  %v2756_v51 = vpack.c.bf16 %v786_v49, %v781_v47  ;;  %v787_v55 = vld [vmem:[%s3810_s4 + $0x50] sm:$0x3] }
  0x33   : > { %2727 = vmatprep.subr.bf16.mxu0 %v2815_v39  ;;  %2443 = vmatprep.mubr.msk.f32.mxu0 %vm491_vm0, %v394_v56 }
  0x34   : > { %2448 = vmatpush1.msk.msra.mxu1 %vm799_vm1, %v787_v55  ;;  %2801 = vset.pattern.permute.xlu0 %v2822_v54  ;;  %v2823_v55 = vmov 0  }
  0x35   : > { %2800 = vset.pattern.permute.xlu1 %v2823_v55 }
  0x36   : > { %2729 = vmatpush1.bf16.msra.mxu0 %v2728_v57  ;;  %v2817_v57 = vmov 0.0  }
  0x37   : > { %2730 = vmatprep.subr.bf16.mxu0 %v2815_v39  ;;  %879 = vmatprep.mubr.f32.mxu1 %v2817_v57 }
  0x3a   : > { %2732 = vmatpush1.bf16.msra.mxu0 %v2731_v60 }
  0x3b   : > { %2733 = vmatprep.subr.bf16.mxu0 %v2815_v39 }
  0x3e   : > { %2735 = vmatpush1.bf16.msra.mxu0 %v2734_v63  ;;  %v2752_v63 = vpack.c.bf16 %v785_v62, %v780_v61  ;;  %v2824_v61 = vmov 4   ;;  %v2825_v62 = vmov 2  }
  0x3f   : > { %2736 = vmatprep.subr.bf16.mxu0 %v2815_v39 }
  0x40   : > { %2753 = vmatprep.subr.bf16.mxu1 %v2752_v63  ;;  %v2826_v63 = vmov 3  }
  0x42   : > { %2738 = vmatpush1.bf16.msra.mxu0 %v2737_v2 }
  0x43   : > { %2739 = vmatprep.subr.bf16.mxu0 %v2815_v39 }
  0x46   : > { %2741 = vmatpush1.bf16.msra.mxu0 %v2740_v5 }
  0x47   : > { %2742 = vmatprep.subr.bf16.mxu0 %v2815_v39 }
  0x4a   : > { %2744 = vmatpush1.bf16.msra.mxu0 %v2743_v8  ;;  %v2446_v8 = vld [vmem:[%s3809_s3] ss:$0 sm:$0xff] }
  0x4b   : > { %2745 = vmatprep.subr.bf16.mxu0 %v2815_v39 }
  0x4e   : > { %2747 = vmatpush1.bf16.msra.mxu0 %v2746_v11 }
  0x4f   : > { %2757 = vmatprep.subr.bf16.mxu0 %v2756_v51 }
  0x51   : > { %726 = vmatmul.mubr.f32.vlgmr.msra.gmra.mrb[6].mxu0 %v393_v12  ;;  %v779_v12 = vld [vmem:[%s3810_s4 + $0x10] sm:$0xff] }
  0x52   : > { %2444 = vmatprep.mubr.msk.f32.mxu0 %vm491_vm0, %v400_v13  ;;  %2759 = vmatpush3.bf16.msra.mxu0 %v2756_v51  ;;  %v784_v13 = vld [vmem:[%s3810_s4 + $0x38] sm:$0xff] }
  0x53   : > { %2618 = vmatprep.subr.msk.mxu0 %vm799_vm1, %v791_v58 }
  0x55   : > { %731 = vmatmul.mubr.f32.gmra.mrb[8].mxu0 %v399_v14 }
  0x56   : > { %2445 = vmatprep.mubr.msk.f32.mxu0 %vm491_vm0, %v406_v15  ;;  %2619 = vmatpush3.msk.msra.mxu0 %vm799_vm1, %v791_v58 }
  0x59   : > { %736 = vmatmul.mubr.f32.gmra.mrb[10].mxu0 %v405_v16  ;;  %v2754_v16 = vpack.c.bf16 %v784_v13, %v779_v12 }
  0xfc   : > { %v2541_v17 = vpop.f32.mrb[0].mxu0 }
  0xfd   : > { %v2582_v18 = vpop.f32.mrb[0].mxu1  ;;  %v2542_v19 = vpop.f32.mrb[1].mxu0 }
  0xfe   : > { %v2543_v20 = vadd.f32 %v2542_v19, %v2541_v17  ;;  %v2583_v21 = vpop.f32.mrb[1].mxu1  ;;  %v790_v19 = vld [vmem:[%s3810_s4 + $0x68] sm:$0x3] }
  0xff   : > { %v2584_v22 = vadd.f32 %v2583_v21, %v2582_v18  ;;  %v2458_v21 = vld [vmem:[%s3811_s5] ss:$0 sm:$0xff] }
 0x100   : > { %v2544_v23 = vpop.f32.mrb[2].mxu0 }
 0x101   : > { %v2585_v24 = vpop.f32.mrb[2].mxu1  ;;  %v2545_v25 = vpop.f32.mrb[3].mxu0  ;;  %v648_v26 = vadd.f32 %v2584_v22, %v2543_v20  ;;  %v789_v20 = vld [vmem:[%s3810_s4 + $0x60] sm:$0x3] }
 0x102   : > { %v2546_v27 = vadd.f32 %v2545_v25, %v2544_v23  ;;  %v2586_v28 = vpop.f32.mrb[3].mxu1 }
 0x103   : > { %v2587_v29 = vadd.f32 %v2586_v28, %v2585_v24 }
 0x104   : > { %v2547_v30 = vpop.f32.mrb[4].mxu0 }
 0x105   : > { %v2588_v31 = vpop.f32.mrb[4].mxu1  ;;  %v2548_v32 = vpop.f32.mrb[5].mxu0  ;;  %v653_v33 = vadd.f32 %v2587_v29, %v2546_v27 }
 0x106   : > { %v2549_v34 = vadd.f32 %v2548_v32, %v2547_v30  ;;  %v2589_v35 = vpop.f32.mrb[5].mxu1 }
 0x107   : > { %v2590_v36 = vadd.f32 %v2589_v35, %v2588_v31 }
 0x109   : > { %v658_v37 = vadd.f32 %v2590_v36, %v2549_v34 }
 0x124   : > { %v727_v42 = vpop.f32.mrb[6].mxu0 }
 0x125   : > { %v728_v43 = vadd.f32 %v727_v42, %v648_v26  ;;  %v729_v44 = vpop.f32.mrb[7].mxu0  ;;  %v1086_v42 = vld [vmem:[%s3812_s6 + $0x8] sm:$0x3] }
 0x127   : > { %743 = vrot.lane.b32.xlu1 %v728_v43, %s2816_s22 }
 0x128   : > { %v732_v50 = vpop.f32.mrb[8].mxu0 }
 0x129   : > { %v733_v52 = vadd.f32 %v732_v50, %v653_v33  ;;  %v734_v53 = vpop.f32.mrb[9].mxu0 }
 0x12b   : > { %745 = vrot.lane.b32.xlu0 %v733_v52, %s2816_s22 }
 0x12c   : > { %v737_v56 = vpop.f32.mrb[10].mxu0 }
 0x12d   : > { %v738_v59 = vadd.f32 %v737_v56, %v658_v37  ;;  %v739_v60 = vpop.f32.mrb[11].mxu0  ;;  %v1087_v56 = vld [vmem:[%s3813_s7] sm:$0x1] }
 0x12f   : > { %752 = vrot.lane.b32.xlu0 %v738_v59, %s2816_s22 }
 0x199   : > { %v744_v3 = vpop.permute.xlu1 %743 }
 0x19a   : > { %v749_v7 = vmax.f32 %v728_v43, %v744_v3  ;;  %v2761_v43 = vpack.c.bf16 %v1086_v42, %v1085_v41 }
 0x19d   : > { %v746_v0 = vpop.permute.xlu0 %745 }
 0x19e   : > { %v750_v1 = vmax.f32 %v733_v52, %v746_v0  ;;  %v2827_v0 = vmov 5  }
 0x1a0   : > { %v759_v5 = vrot.slane %v750_v1, 1 }
 0x1a1   : > { %v753_v2 = vpop.permute.xlu0 %752 }
 0x1a2   : > { %v755_v4 = vmax.f32 %v738_v59, %v753_v2 }
 0x1a4   : > { %v760_v6 = vrot.slane %v755_v4, 1 }
 0x1a6   : > { %v761_v9 = vsel %vm758_vm2, %v759_v5, %v760_v6  ;;  %v765_v10 = vmax.f32 %v750_v1, %v760_v6  ;;  %v382_v1 = vlaneseq }
 0x1a7   : > { %v764_v11 = vmax.f32 %v749_v7, %v761_v9  ;;  %v380_v7 = vld [vmem:[%s3814_s8] sm:$0x1f] }
 0x1a8   : > { %v774_v14 = vadd.f32 %v2446_v8, %v765_v10  ;;  %v383_v2 = vshrl.u32 %v382_v1, 7  ;;  %v381_v9 = vld [vmem:[%s3815_s9] sm:$0x1f] }
 0x1a9   : > { %v773_v15 = vadd.f32 %v2446_v8, %v764_v11 }
 0x1aa   : > { %v776_v18 = vmax.f32 %v774_v14, 0.0  ;;  %v3273_v3 = vsub.s32 0, %v383_v2  ;;  %v1177_v4 = vsub.s32 1, %v383_v2  ;;  %v1181_v5 = vsub.s32 2, %v383_v2 }
 0x1ab   : > { %v775_v17 = vmax.f32 %v773_v15, 0.0  ;;  %v1185_v6 = vsub.s32 3, %v383_v2  ;;  %v1189_v8 = vsub.s32 4, %v383_v2  ;;  %v3283_v41 = vcvt.s32.f32 %v383_v2 }
 0x1ac   : > { %v1174_v10 = vrot.slane %v380_v7, %v3273_v3  ;;  %v1178_v11 = vrot.slane %v380_v7, %v1177_v4  ;;  %v1182_v12 = vrot.slane %v380_v7, %v1181_v5  ;;  %v1209_v15 = vrot.slane %v381_v9, %v3273_v3 }
 0x1ad   : > { %2449 = vmatmul.mubr.msk.f32.vlgmr.msra.gmra.mrb[6].mxu1 %vm792_vm3, %v775_v17  ;;  %2620 = vmatprep.mubr.msk.f32.mxu0 %vm792_vm3, %v775_v17  ;;  %v1186_v13 = vrot.slane %v380_v7, %v1185_v6  ;;  %v1190_v14 = vrot.slane %v380_v7, %v1189_v8 }
 0x1ae   : > { %2755 = vmatpush1.bf16.msra.mxu1 %v2754_v16  ;;  %2621 = vmatmul.mubr.msk.f32.vlgmr.msra.gmra.mrb[12].mxu0 %vm792_vm3, %v776_v18  ;;  %v1213_v16 = vrot.slane %v381_v9, %v1177_v4 }
 0x1af   : > { %885 = vmatprep.mubr.f32.mxu1 %v2817_v57  ;;  %2451 = vmatprep.subr.msk.mxu1 %vm799_vm1, %v790_v19  ;;  %v1225_v19 = vrot.slane %v381_v9, %v1189_v8 }
 0x1b0   : > { %1922 = vmatprep.mubr.f32.mxu0 %v2817_v57 }
 0x1b1   : > { %2450 = vmatmul.mubr.msk.f32.gmra.mrb[8].mxu1 %vm792_vm3, %v776_v18 }
 0x1b2   : > { %2452 = vmatpush1.msk.msra.mxu1 %vm799_vm1, %v789_v20  ;;  %954 = vmatprep.mubr.f32.mxu1 %v2817_v57 }
 0x1b3   : > { %2760 = vmatprep.subr.bf16.mxu1 %v2815_v39 }
 0x1b5   : > { %2453 = vmatmul.mubr.msk.f32.vlgmr.msra.gmra.mrb[10].mxu1 %vm792_vm3, %v775_v17  ;;  %v1217_v17 = vrot.slane %v381_v9, %v1181_v5 }
 0x1b6   : > { %960 = vmatprep.mubr.f32.mxu1 %v2817_v57  ;;  %2763 = vmatpush3.bf16.msk.msra.mxu1 %vm2762_vm5, %v2761_v43  ;;  %vm1684_vm5 = vcmask 195584  }
 0x1b9   : > { %2454 = vmatmul.mubr.msk.f32.gmra.mrb[12].mxu1 %vm792_vm3, %v776_v18  ;;  %v1221_v18 = vrot.slane %v381_v9, %v1185_v6 }
 0x1ba   : > { %2627 = vmatprep.mubr.msk.f32.mxu1 %vm2820_vm6, %v2817_v57 }
 0x280   : > { %v881_v22 = vpop.f32.mrb[6].mxu1 }
 0x281   : > { %v1046_v23 = vadd.f32 %v2458_v21, %v881_v22  ;;  %v883_v24 = vpop.f32.mrb[7].mxu1  ;;  %v2622_v25 = vpop.f32.mrb[12].mxu0 }
 0x282   : > { %v1048_v26 = vrot.slane %v883_v24, 1  ;;  %v1031_v27 = vpop.f32.mrb[13].mxu0 }
 0x283   : > { %v1060_v36 = vrot.slane %v1031_v27, 4 }
 0x284   : > { %v1050_v28 = vadd.f32 %v1048_v26, %v1046_v23  ;;  %v887_v29 = vpop.f32.mrb[8].mxu1 }
 0x285   : > { %v888_v30 = vpop.f32.mrb[9].mxu1 }
 0x286   : > { %v384_v30 = vadd.s32 8, %v383_v2 }
 0x288   : > { %v956_v39 = vpop.f32.mrb[10].mxu1  ;;  %v3285_v42 = vcvt.s32.f32 %v384_v30 }
 0x289   : > { %v1052_v31 = vrot.slane %v956_v39, 2  ;;  %v958_v32 = vpop.f32.mrb[11].mxu1 }
 0x28a   : > { %v1056_v33 = vrot.slane %v958_v32, 3 }
 0x28b   : > { %v1054_v34 = vadd.f32 %v1052_v31, %v1050_v28 }
 0x28c   : > { %v962_v35 = vpop.f32.mrb[12].mxu1 }
 0x28d   : > { %v1058_v37 = vadd.f32 %v1056_v33, %v1054_v34  ;;  %v963_v38 = vpop.f32.mrb[13].mxu1 }
 0x28f   : > { %v1062_v40 = vadd.f32 %v1060_v36, %v1058_v37 }
 0x291   : > { %1064 = vrot.lane.b32.xlu1 %v1062_v40, %s2818_s16 }
 0x303   : > { %v1065_v44 = vpop.permute.xlu1 %1064 }
 0x304   : > { %v1067_v45 = vmax.f32 %v1062_v40, %v1065_v44  ;;  %v385_v40 = vadd.s32 16, %v383_v2 }
 0x306   : > { %v1069_v46 = vrot.slane %v1067_v45, 1  ;;  %v3295_v30 = vcvt.s32.f32 %v385_v40 }
 0x308   : > { %v1071_v47 = vmax.f32 %v1067_v45, %v1069_v46 }
 0x30a   : > { %v1072_v48 = vmax.f32 %v1071_v47, 0.0 }
 0x30c   : > { %v1075_v49 = vrot.slane %v1072_v48, 2 }
 0x30e   : > { %v1077_v50 = vadd.f32 %v1075_v49, %v1072_v48 }
 0x310   : > { %1080 = vrot.lane.b32.xlu0 %v1077_v50, %s2821_s21 }
 0x382   : > { %v1081_v51 = vpop.permute.xlu0 %1080 }
 0x383   : > { %v1083_v52 = vadd.f32 %v1081_v51, %v1077_v50 }
 0x385   : > { %v1084_v53 = vmul.f32 0.25, %v1083_v52 }
 0x387   : > { %2628 = vmatmul.mubr.msk.f32.vlgmr.msra.gmra.mrb[14].mxu1 %vm1088_vm7, %v1084_v53 }
 0x388   : > { %1785 = vmatprep.mubr.f32.mxu1 %v2817_v57 }
 0x45a   : > { %v1161_v58 = vpop.f32.mrb[14].mxu1 }
 0x45b   : > { %v1162_v59 = vadd.f32 %v1161_v58, %v1087_v56  ;;  %v2629_v60 = vpop.f32.mrb[15].mxu1 }
 0x45d   : > { %1202 = vperm.xlu0 %2801, %v1162_v59   ;;  %1167 = vperm.xlu1 %2800, %v1162_v59  }
 0x461   : > { %2804 = vset.pattern.permute.xlu0 %v2824_v61  ;;  %2802 = vset.pattern.permute.xlu1 %v2825_v62 }
 0x462   : > { %1260 = vperm.xlu0 %2804, %v1162_v59   ;;  %1242 = vperm.xlu1 %2802, %v1162_v59  }
 0x466   : > { %2803 = vset.pattern.permute.xlu1 %v2826_v63  ;;  %2806 = vset.pattern.permute.xlu0 %v2827_v0 }
 0x467   : > { %1251 = vperm.xlu1 %2803, %v1162_v59  }
 0x46b   : > { %2805 = vset.pattern.permute.xlu1 %v2827_v0 }
 0x46c   : > { %1274 = vperm.xlu1 %2805, %v1162_v59  }
 0x4dc   : > { %v1203_v20 = vpop.permute.xlu0 %1202  ;;  %v1168_v21 = vpop.permute.xlu1 %1167 }
 0x4dd   : > { %v1196_v22 = vmul.f32 %v1174_v10, %v1168_v21  ;;  %v1197_v23 = vmul.f32 %v1178_v11, %v1168_v21  ;;  %v1198_v24 = vmul.f32 %v1182_v12, %v1168_v21  ;;  %v1199_v25 = vmul.f32 %v1186_v13, %v1168_v21 }
 0x4de   : > { %v1200_v26 = vmul.f32 %v1190_v14, %v1168_v21  ;;  %v1231_v27 = vmul.f32 %v1209_v15, %v1203_v20  ;;  %v1232_v28 = vmul.f32 %v1213_v16, %v1203_v20  ;;  %v1233_v29 = vmul.f32 %v1217_v17, %v1203_v20 }
 0x4df   : > { %v1234_v39 = vmul.f32 %v1221_v18, %v1203_v20  ;;  %v1235_v31 = vmul.f32 %v1225_v19, %v1203_v20 }
 0x4e0   : > { %v1236_v32 = vadd.f32 %v1231_v27, %v1196_v22  ;;  %v1237_v33 = vadd.f32 %v1232_v28, %v1197_v23  ;;  %v1238_v34 = vadd.f32 %v1233_v29, %v1198_v24 }
 0x4e1   : > { %v1261_v35 = vpop.permute.xlu0 %1260  ;;  %v1239_v36 = vadd.f32 %v1234_v39, %v1199_v25  ;;  %v1240_v37 = vadd.f32 %v1235_v31, %v1200_v26  ;;  %v1243_v38 = vpop.permute.xlu1 %1242 }
 0x4e2   : > { %v1245_v43 = vadd.f32 %v1243_v38, %v1236_v32  ;;  %v1246_v44 = vadd.f32 %v1243_v38, %v1237_v33  ;;  %v1247_v45 = vadd.f32 %v1243_v38, %v1238_v34  ;;  %v1263_v46 = vmul.f32 %v1261_v35, %v1209_v15 }
 0x4e3   : > { %v1264_v47 = vmul.f32 %v1261_v35, %v1213_v16  ;;  %v1248_v48 = vadd.f32 %v1243_v38, %v1239_v36  ;;  %v1249_v49 = vadd.f32 %v1243_v38, %v1240_v37  ;;  %v1265_v50 = vmul.f32 %v1261_v35, %v1217_v17 }
 0x4e4   : > { %v1282_v51 = vadd.f32 1.0, %v1245_v43  ;;  %v1283_v52 = vadd.f32 1.0, %v1246_v44  ;;  %v1284_v53 = vadd.f32 1.0, %v1247_v45  ;;  %v1266_v54 = vmul.f32 %v1261_v35, %v1221_v18 }
 0x4e5   : > { %v1267_v55 = vmul.f32 %v1261_v35, %v1225_v19  ;;  %v1285_v56 = vadd.f32 1.0, %v1248_v48  ;;  %v1286_v58 = vadd.f32 1.0, %v1249_v49 }
 0x4e6   : > { %v1252_v59 = vpop.permute.xlu1 %1251  ;;  %v1287_v60 = vmul.f32 24.0, %v1282_v51  ;;  %v1288_v61 = vmul.f32 24.0, %v1283_v52  ;;  %v1289_v62 = vmul.f32 24.0, %v1284_v53 }
 0x4e7   : > { %v1254_v63 = vmul.f32 %v1252_v59, %v1174_v10  ;;  %v1290_v0 = vmul.f32 24.0, %v1285_v56  ;;  %v1291_v1 = vmul.f32 24.0, %v1286_v58  ;;  %v1255_v2 = vmul.f32 %v1252_v59, %v1178_v11 }
 0x4e8   : > { %v1256_v4 = vmul.f32 %v1252_v59, %v1182_v12  ;;  %v2461_v5 = vadd.f32 -1.0, %v1287_v60  ;;  %v2462_v6 = vadd.f32 -1.0, %v1288_v61  ;;  %v2463_v7 = vadd.f32 -1.0, %v1289_v62 }
 0x4e9   : > { %v1257_v8 = vmul.f32 %v1252_v59, %v1186_v13  ;;  %v2464_v9 = vadd.f32 -1.0, %v1290_v0  ;;  %v2465_v15 = vadd.f32 -1.0, %v1291_v1  ;;  %v1258_v16 = vmul.f32 %v1252_v59, %v1190_v14 }
 0x4ea   : > { %v1268_v17 = vadd.f32 %v1263_v46, %v1254_v63  ;;  %v1297_v18 = vmul.f32 0.5, %v2461_v5  ;;  %v1298_v19 = vmul.f32 0.5, %v2462_v6  ;;  %v1299_v20 = vmul.f32 0.5, %v2463_v7 }
 0x4eb   : > { %v1269_v21 = vadd.f32 %v1264_v47, %v1255_v2  ;;  %v1275_v22 = vpop.permute.xlu1 %1274  ;;  %v1300_v23 = vmul.f32 0.5, %v2464_v9  ;;  %v1301_v24 = vmul.f32 0.5, %v2465_v15  ;;  %v1270_v10 = vadd.f32 %v1265_v50, %v1256_v4 }
 0x4ec   : > { %v1271_v25 = vadd.f32 %v1266_v54, %v1257_v8  ;;  %v3287_v26 = vfloor.f32 %v1297_v18  ;;  %v1323_v11 = vfloor.f32 %v1298_v19  ;;  %v3289_v12 = vfloor.f32 %v1299_v20 }
 0x4ed   : > { %v1272_v27 = vadd.f32 %v1267_v55, %v1258_v16  ;;  %v3291_v13 = vfloor.f32 %v1300_v23  ;;  %v3293_v28 = vfloor.f32 %v1301_v24  ;;  %v1277_v14 = vadd.f32 %v1275_v22, %v1268_v17 }
 0x4ee   : > { %v1278_v29 = vadd.f32 %v1275_v22, %v1269_v21  ;;  %v3298_v39 = vsub.f32 %v1297_v18, %v3287_v26  ;;  %v1333_v31 = vsub.f32 %v1298_v19, %v1323_v11  ;;  %v3301_v32 = vsub.f32 %v1299_v20, %v3289_v12 }
 0x4ef   : > { %v3304_v33 = vsub.f32 %v1300_v23, %v3291_v13  ;;  %v3307_v34 = vsub.f32 %v1301_v24, %v3293_v28  ;;  %v3310_v35 = vadd.f32 1.0, %v3287_v26  ;;  %v1279_v36 = vadd.f32 %v1275_v22, %v1270_v10 }
 0x4f0   : > { %v1337_v37 = vsub.f32 1.0, %v3298_v39  ;;  %v1339_v38 = vsub.f32 1.0, %v3301_v32  ;;  %v3315_v40 = vadd.f32 1.0, %v3289_v12  ;;  %v3319_v43 = vrot.slane %v3298_v39, %v3273_v3 }
 0x4f1   : > { %v1280_v44 = vadd.f32 %v1275_v22, %v1271_v25  ;;  %v1281_v45 = vadd.f32 %v1275_v22, %v1272_v27  ;;  %v1302_v46 = vadd.f32 1.0, %v1277_v14  ;;  %v1303_v47 = vadd.f32 1.0, %v1278_v29 }
 0x4f2   : > { %v1304_v48 = vadd.f32 1.0, %v1279_v36  ;;  %v1338_v49 = vsub.f32 1.0, %v1333_v31  ;;  %v3322_v50 = vrot.slane %v1323_v11, %v3273_v3  ;;  %v1423_v51 = vadd.f32 1.0, %v1323_v11 }
 0x4f3   : > { %v1305_v52 = vadd.f32 1.0, %v1280_v44  ;;  %v1306_v53 = vadd.f32 1.0, %v1281_v45  ;;  %v1307_v54 = vmul.f32 24.0, %v1302_v46  ;;  %v1308_v55 = vmul.f32 24.0, %v1303_v47 }
 0x4f4   : > { %v3326_v56 = vrot.slane %v3301_v32, %v3273_v3  ;;  %v1309_v58 = vmul.f32 24.0, %v1304_v48  ;;  %vm1373_vm8 = vcmp.eq.f32.partialorder %v3283_v41, %v3322_v50  ;;  %v3331_v59 = vrot.slane %v1338_v49, %v3273_v3 }
 0x4f5   : > { %v1310_v60 = vmul.f32 24.0, %v1305_v52  ;;  %v1311_v61 = vmul.f32 24.0, %v1306_v53  ;;  %v2466_v62 = vadd.f32 -1.0, %v1307_v54  ;;  %v2467_v63 = vadd.f32 -1.0, %v1308_v55 }
 0x4f6   : > { %v2468_v0 = vadd.f32 -1.0, %v1309_v58  ;;  %vm1378_vm9 = vcmp.eq.f32.partialorder %v3285_v42, %v3322_v50  ;;  %v1408_v1 = vsel %vm1373_vm8, %v3331_v59, 0.0  ;;  %v3337_v2 = vrot.slane %v1423_v51, %v3273_v3 }
 0x4f7   : > { %v2469_v4 = vadd.f32 -1.0, %v1310_v60  ;;  %v2470_v5 = vadd.f32 -1.0, %v1311_v61  ;;  %v1317_v6 = vmul.f32 0.5, %v2466_v62  ;;  %v1318_v7 = vmul.f32 0.5, %v2467_v63 }
 0x4f8   : > { %v1319_v8 = vmul.f32 0.5, %v2468_v0  ;;  %vm1448_vm10 = vcmp.eq.f32.partialorder %v3283_v41, %v3337_v2  ;;  %vm1453_vm11 = vcmp.eq.f32.partialorder %v3285_v42, %v3337_v2  ;;  %v3344_v9 = vrot.slane %v1333_v31, %v3273_v3 }
 0x4f9   : > { %v1320_v15 = vmul.f32 0.5, %v2469_v4  ;;  %v1321_v16 = vmul.f32 0.5, %v2470_v5  ;;  %v1327_v17 = vfloor.f32 %v1317_v6  ;;  %v1328_v18 = vfloor.f32 %v1318_v7 }
 0x4fa   : > { %v1329_v19 = vfloor.f32 %v1319_v8  ;;  %v1413_v20 = vsel %vm1378_vm9, %v3331_v59, 0.0  ;;  %v1483_v21 = vsel %vm1448_vm10, %v3344_v9, 0.0  ;;  %v1488_v22 = vsel %vm1453_vm11, %v3344_v9, 0.0 }
 0x4fb   : > { %v1330_v23 = vfloor.f32 %v1320_v15  ;;  %v3352_v24 = vfloor.f32 %v1321_v16  ;;  %v1342_v10 = vsub.f32 %v1317_v6, %v1327_v17  ;;  %v1343_v25 = vsub.f32 %v1318_v7, %v1328_v18 }
 0x4fc   : > { %v1344_v11 = vsub.f32 %v1319_v8, %v1329_v19  ;;  %v3355_v27 = vrot.slane %v1327_v17, %v3273_v3  ;;  %v3358_v14 = vrot.slane %v1328_v18, %v3273_v3  ;;  %v1340_v29 = vsub.f32 1.0, %v3304_v33 }
 0x4fd   : > { %v1345_v31 = vsub.f32 %v1320_v15, %v1330_v23  ;;  %v1346_v36 = vsub.f32 %v1321_v16, %v3352_v24  ;;  %v1347_v44 = vsub.f32 1.0, %v1342_v10  ;;  %v1348_v45 = vsub.f32 1.0, %v1343_v25 }
 0x4fe   : > { %v1349_v46 = vsub.f32 1.0, %v1344_v11  ;;  %v3363_v47 = vrot.slane %v1329_v19, %v3273_v3  ;;  %v3366_v48 = vrot.slane %v1330_v23, %v3273_v3  ;;  %v3370_v49 = vrot.slane %v3352_v24, %v3273_v3 }
 0x4ff   : > { %v1350_v51 = vsub.f32 1.0, %v1345_v31  ;;  %v1351_v52 = vsub.f32 1.0, %v1346_v36  ;;  %v3373_v53 = vrot.slane %v1347_v44, %v3273_v3  ;;  %v3375_v54 = vadd.f32 1.0, %v1327_v17 }
 0x500   : > { %v3378_v55 = vrot.slane %v1348_v45, %v3273_v3  ;;  %v3381_v58 = vrot.slane %v1349_v46, %v3273_v3  ;;  %v3383_v60 = vadd.f32 1.0, %v1328_v18  ;;  %v3385_v61 = vadd.f32 1.0, %v1329_v19 }
 0x501   : > { %v3388_v62 = vrot.slane %v1350_v51, %v3273_v3  ;;  %v3391_v63 = vrot.slane %v1351_v52, %v3273_v3  ;;  %v3393_v0 = vadd.f32 1.0, %v1330_v23  ;;  %v3396_v4 = vrot.slane %v1342_v10, %v3273_v3 }
 0x502   : > { %v3399_v5 = vrot.slane %v1343_v25, %v3273_v3  ;;  %v3402_v6 = vrot.slane %v1344_v11, %v3273_v3  ;;  %v3405_v7 = vrot.slane %v1345_v31, %v3273_v3  ;;  %v3408_v8 = vrot.slane %v1346_v36, %v3273_v3 }
 0x503   : > { %v1498_v15 = vadd.f32 %v1483_v21, %v1408_v1  ;;  %v1503_v16 = vadd.f32 %v1488_v22, %v1413_v20  ;;  %v1367_v17 = vrot.slane %v3291_v13, %v3273_v3  ;;  %v1402_v18 = vrot.slane %v1340_v29, %v3273_v3 }
 0x504   : > { %v1425_v19 = vadd.f32 1.0, %v3291_v13  ;;  %v1477_v23 = vrot.slane %v3304_v33, %v3273_v3  ;;  %v1355_v10 = vrot.slane %v3287_v26, %v3273_v3  ;;  %v1390_v25 = vrot.slane %v1337_v37, %v3273_v3 }
 0x505   : > { %v2764_v11 = vpack.c.bf16 %v1503_v16, %v1498_v15  ;;  %vm1375_vm12 = vcmp.eq.f32.partialorder %v3283_v41, %v1367_v17  ;;  %vm1380_vm13 = vcmp.eq.f32.partialorder %v3285_v42, %v1367_v17  ;;  %v1430_v1 = vrot.slane %v3310_v35, %v3273_v3 }
 0x506   : > { %v1410_v20 = vsel %vm1375_vm12, %v1402_v18, 0.0  ;;  %v1415_v13 = vsel %vm1380_vm13, %v1402_v18, 0.0  ;;  %v1442_v21 = vrot.slane %v1425_v19, %v3273_v3  ;;  %vm1372_vm14 = vcmp.eq.f32.partialorder %v3283_v41, %v1355_v10 }
 0x507   : > { %2765 = vmatprep.subr.bf16.mxu1 %v2764_v11  ;;  %vm1377_vm15 = vcmp.eq.f32.partialorder %v3285_v42, %v1355_v10  ;;  %v1407_v26 = vsel %vm1372_vm14, %v1390_v25, 0.0  ;;  %vm1447_vm0 = vcmp.eq.f32.partialorder %v3283_v41, %v1430_v1  ;;  %vm1452_vm2 = vcmp.eq.f32.partialorder %v3285_v42, %v1430_v1 }
 0x508   : > { %vm1450_vm3 = vcmp.eq.f32.partialorder %v3283_v41, %v1442_v21  ;;  %vm1455_vm4 = vcmp.eq.f32.partialorder %v3285_v42, %v1442_v21  ;;  %v1412_v39 = vsel %vm1377_vm15, %v1390_v25, 0.0  ;;  %v1482_v33 = vsel %vm1447_vm0, %v3319_v43, 0.0 }
 0x509   : > { %v1485_v35 = vsel %vm1450_vm3, %v1477_v23, 0.0  ;;  %v1490_v37 = vsel %vm1455_vm4, %v1477_v23, 0.0  ;;  %v1487_v22 = vsel %vm1452_vm2, %v3319_v43, 0.0  ;;  %v1497_v29 = vadd.f32 %v1482_v33, %v1407_v26  ;;  %v3467_v33 = vld [vmem:[%s3458_s26] sm:$0xff] }
 0x50a   : > { %v1500_v31 = vadd.f32 %v1485_v35, %v1410_v20  ;;  %v1505_v36 = vadd.f32 %v1490_v37, %v1415_v13  ;;  %v1502_v44 = vadd.f32 %v1487_v22, %v1412_v39  ;;  %v1363_v45 = vrot.slane %v3289_v12, %v3273_v3 }
 0x50b   : > { %v1398_v46 = vrot.slane %v1339_v38, %v3273_v3  ;;  %v1438_v51 = vrot.slane %v3315_v40, %v3273_v3  ;;  %vm1383_vm6 = vcmp.eq.f32.partialorder %v3295_v30, %v3322_v50  ;;  %vm1458_vm7 = vcmp.eq.f32.partialorder %v3295_v30, %v3337_v2 }
 0x50c   : > { %v2768_v52 = vpack.c.bf16 %v1505_v36, %v1500_v31  ;;  %v2766_v15 = vpack.c.bf16 %v1502_v44, %v1497_v29  ;;  %vm1374_vm8 = vcmp.eq.f32.partialorder %v3283_v41, %v1363_v45  ;;  %vm1379_vm9 = vcmp.eq.f32.partialorder %v3285_v42, %v1363_v45 }
 0x50d   : > { %v1409_v12 = vsel %vm1374_vm8, %v1398_v46, 0.0  ;;  %v1414_v16 = vsel %vm1379_vm9, %v1398_v46, 0.0  ;;  %vm1449_vm10 = vcmp.eq.f32.partialorder %v3283_v41, %v1438_v51  ;;  %vm1454_vm11 = vcmp.eq.f32.partialorder %v3285_v42, %v1438_v51 }
 0x50e   : > { %2769 = vmatprep.subr.bf16.mxu0 %v2768_v52  ;;  %2767 = vmatpush1.bf16.msra.mxu1 %v2766_v15  ;;  %v1484_v32 = vsel %vm1449_vm10, %v3326_v56, 0.0  ;;  %v1489_v38 = vsel %vm1454_vm11, %v3326_v56, 0.0  ;;  %v1418_v40 = vsel %vm1383_vm6, %v3331_v59, 0.0  ;;  %v1493_v50 = vsel %vm1458_vm7, %v3344_v9, 0.0 }
 0x50f   : > { %v1499_v2 = vadd.f32 %v1484_v32, %v1409_v12  ;;  %v1504_v19 = vadd.f32 %v1489_v38, %v1414_v16  ;;  %v1508_v11 = vadd.f32 %v1493_v50, %v1418_v40  ;;  %vm1385_vm12 = vcmp.eq.f32.partialorder %v3295_v30, %v1367_v17  ;;  %v3510_v12 = vld [vmem:[%s3458_s26 + $0x10] sm:$0xff] }
 0x510   : > { %v1420_v20 = vsel %vm1385_vm12, %v1402_v18, 0.0  ;;  %vm1460_vm13 = vcmp.eq.f32.partialorder %v3295_v30, %v1442_v21  ;;  %vm1382_vm14 = vcmp.eq.f32.partialorder %v3295_v30, %v1355_v10  ;;  %vm1457_vm15 = vcmp.eq.f32.partialorder %v3295_v30, %v1430_v1 }
 0x511   : > { %v2770_v59 = vpack.c.bf16 %v1504_v19, %v1499_v2  ;;  %1725 = vmatprep.subr.mxu1 %v1508_v11  ;;  %v1495_v9 = vsel %vm1460_vm13, %v1477_v23, 0.0  ;;  %v1417_v13 = vsel %vm1382_vm14, %v1390_v25, 0.0  ;;  %v1492_v26 = vsel %vm1457_vm15, %v3319_v43, 0.0 }
 0x512   : > { %v1510_v17 = vadd.f32 %v1495_v9, %v1420_v20  ;;  %v1507_v39 = vadd.f32 %v1492_v26, %v1417_v13  ;;  %vm1384_vm0 = vcmp.eq.f32.partialorder %v3295_v30, %v1363_v45  ;;  %vm1459_vm2 = vcmp.eq.f32.partialorder %v3295_v30, %v1438_v51 }
 0x513   : > { %2771 = vmatpush1.bf16.msra.mxu0 %v2770_v59  ;;  %v1419_v18 = vsel %vm1384_vm0, %v1398_v46, 0.0  ;;  %v1494_v10 = vsel %vm1459_vm2, %v3326_v56, 0.0  ;;  %v1341_v1 = vsub.f32 1.0, %v3307_v34  ;;  %v1371_v23 = vrot.slane %v3293_v28, %v3273_v3 }
 0x514   : > { %1862 = vmatprep.subr.mxu0 %v1510_v17  ;;  %1726 = vmatpush1.msra.mxu1 %v1507_v39  ;;  %v1509_v43 = vadd.f32 %v1494_v10, %v1419_v18  ;;  %v1426_v25 = vadd.f32 1.0, %v3293_v28  ;;  %v1481_v21 = vrot.slane %v3307_v34, %v3273_v3  ;;  %vm1532_vm3 = vcmp.eq.f32.partialorder %v3283_v41, %v3355_v27  ;;  %v3487_v28 = vld [vmem:[%s3458_s26 + $0x8] sm:$0xff]  ;;  %v3582_v10 = vld [vmem:[%s3458_s26 + $0x20] sm:$0xff] }
 0x515   : > { %2471 = vmatmul.mubr.msk.f32.vlgmr.msra.gmra.mrb[16].mxu1 %vm1684_vm5, %v3467_v33  ;;  %vm1376_vm4 = vcmp.eq.f32.partialorder %v3283_v41, %v1371_v23  ;;  %vm1381_vm6 = vcmp.eq.f32.partialorder %v3285_v42, %v1371_v23  ;;  %v1406_v56 = vrot.slane %v1341_v1, %v3273_v3  ;;  %vm1386_vm7 = vcmp.eq.f32.partialorder %v3295_v30, %v1371_v23 }
 0x516   : > { %v1446_v35 = vrot.slane %v1426_v25, %v3273_v3  ;;  %1791 = vmatprep.mubr.f32.mxu1 %v2817_v57  ;;  %v1567_v34 = vsel %vm1532_vm3, %v3373_v53, 0.0  ;;  %v3492_v37 = vrot.slane %v3375_v54, %v3273_v3  ;;  %vm1534_vm8 = vcmp.eq.f32.partialorder %v3283_v41, %v3363_v47 }
 0x517   : > { %1863 = vmatpush1.msra.mxu0 %v1509_v43  ;;  %v1411_v22 = vsel %vm1376_vm4, %v1406_v56, 0.0  ;;  %v1416_v29 = vsel %vm1381_vm6, %v1406_v56, 0.0  ;;  %v1421_v31 = vsel %vm1386_vm7, %v1406_v56, 0.0  ;;  %v1569_v36 = vsel %vm1534_vm8, %v3381_v58, 0.0 }
 0x518   : > { %2483 = vmatmul.mubr.msk.f32.vlgmr.msra.gmra.mrb[14].mxu0 %vm1684_vm5, %v3467_v33  ;;  %vm1451_vm9 = vcmp.eq.f32.partialorder %v3283_v41, %v1446_v35  ;;  %vm1456_vm10 = vcmp.eq.f32.partialorder %v3285_v42, %v1446_v35  ;;  %vm1461_vm11 = vcmp.eq.f32.partialorder %v3295_v30, %v1446_v35  ;;  %vm1607_vm12 = vcmp.eq.f32.partialorder %v3283_v41, %v3492_v37 }
 0x519   : > { %v1486_v54 = vsel %vm1451_vm9, %v1481_v21, 0.0  ;;  %v1491_v44 = vsel %vm1456_vm10, %v1481_v21, 0.0  ;;  %v1496_v45 = vsel %vm1461_vm11, %v1481_v21, 0.0  ;;  %1928 = vmatprep.mubr.f32.mxu0 %v2817_v57  ;;  %2472 = vmatmul.mubr.msk.f32.gmra.mrb[18].mxu1 %vm1684_vm5, %v3487_v28  ;;  %v1642_v46 = vsel %vm1607_vm12, %v3396_v4, 0.0 }
 0x51a   : > { %v1501_v51 = vadd.f32 %v1486_v54, %v1411_v22  ;;  %v1506_v52 = vadd.f32 %v1491_v44, %v1416_v29  ;;  %v1511_v15 = vadd.f32 %v1496_v45, %v1421_v31  ;;  %1797 = vmatprep.mubr.f32.mxu1 %v2817_v57  ;;  %v3512_v16 = vadd.f32 %v1642_v46, %v1567_v34  ;;  %v1682_v45 = vld [vmem:[%s3458_s26 + $0x50] sm:$0xff]  ;;  %v1683_v46 = vld [vmem:[%s3458_s26 + $0x58] sm:$0xff] }
 0x51b   : > { %v3516_v32 = vrot.slane %v3385_v61, %v3273_v3  ;;  %vm1533_vm13 = vcmp.eq.f32.partialorder %v3283_v41, %v3358_v14  ;;  %v3522_v38 = vrot.slane %v3383_v60, %v3273_v3  ;;  %vm1535_vm14 = vcmp.eq.f32.partialorder %v3283_v41, %v3366_v48  ;;  %v3548_v60 = vld [vmem:[%s3458_s26 + $0x18] sm:$0xff] }
 0x51c   : > { %v2772_v40 = vpack.c.bf16 %v1506_v52, %v1501_v51  ;;  %2484 = vmatmul.mubr.msk.f32.gmra.mrb[16].mxu0 %vm1684_vm5, %v3487_v28  ;;  %v1568_v50 = vsel %vm1533_vm13, %v3378_v55, 0.0  ;;  %v1570_v61 = vsel %vm1535_vm14, %v3388_v62, 0.0  ;;  %v3532_v2 = vrot.slane %v3393_v0, %v3273_v3 }
 0x51d   : > { %v3535_v19 = vadd.f32 1.0, %v3352_v24  ;;  %1934 = vmatprep.mubr.f32.mxu0 %v2817_v57  ;;  %2473 = vmatmul.mubr.msk.f32.gmra.mrb[20].mxu1 %vm1684_vm5, %v3510_v12  ;;  %vm1609_vm15 = vcmp.eq.f32.partialorder %v3283_v41, %v3516_v32  ;;  %vm1608_vm0 = vcmp.eq.f32.partialorder %v3283_v41, %v3522_v38  ;;  %vm1537_vm2 = vcmp.eq.f32.partialorder %v3285_v42, %v3355_v27 }
 0x51e   : > { %2773 = vmatprep.subr.bf16.mxu1 %v2772_v40  ;;  %1803 = vmatprep.mubr.f32.mxu1 %v2817_v57  ;;  %v1644_v24 = vsel %vm1609_vm15, %v3402_v6, 0.0  ;;  %v1643_v0 = vsel %vm1608_vm0, %v3399_v5, 0.0  ;;  %vm1610_vm3 = vcmp.eq.f32.partialorder %v3283_v41, %v3532_v2  ;;  %v1572_v11 = vsel %vm1537_vm2, %v3373_v53, 0.0 }
 0x51f   : > { %2775 = vmatpush3.bf16.msra.mxu1 %v2772_v40  ;;  %v3555_v20 = vadd.f32 %v1644_v24, %v1569_v36  ;;  %v3557_v59 = vadd.f32 %v1643_v0, %v1568_v50  ;;  %v1645_v9 = vsel %vm1610_vm3, %v3405_v7, 0.0  ;;  %vm1612_vm4 = vcmp.eq.f32.partialorder %v3285_v42, %v3492_v37 }
 0x520   : > { %2634 = vmatprep.subr.mxu1 %v1511_v15  ;;  %2485 = vmatmul.mubr.msk.f32.gmra.mrb[18].mxu0 %vm1684_vm5, %v3510_v12  ;;  %v3564_v13 = vadd.f32 %v1645_v9, %v1570_v61  ;;  %v1647_v26 = vsel %vm1612_vm4, %v3396_v4, 0.0  ;;  %vm1539_vm6 = vcmp.eq.f32.partialorder %v3285_v42, %v3363_v47  ;;  %vm1614_vm7 = vcmp.eq.f32.partialorder %v3285_v42, %v3516_v32 }
 0x521   : > { %1940 = vmatprep.mubr.f32.mxu0 %v2817_v57  ;;  %2474 = vmatmul.mubr.msk.f32.gmra.mrb[22].mxu1 %vm1684_vm5, %v3548_v60  ;;  %v3574_v17 = vadd.f32 %v1647_v26, %v1572_v11  ;;  %v1574_v39 = vsel %vm1539_vm6, %v3381_v58, 0.0  ;;  %v1649_v18 = vsel %vm1614_vm7, %v3402_v6, 0.0  ;;  %vm1538_vm8 = vcmp.eq.f32.partialorder %v3285_v42, %v3358_v14 }
 0x522   : > { %1809 = vmatprep.mubr.f32.mxu1 %v2817_v57  ;;  %v3584_v1 = vadd.f32 %v1649_v18, %v1574_v39  ;;  %v1573_v23 = vsel %vm1538_vm8, %v3378_v55, 0.0  ;;  %vm1613_vm9 = vcmp.eq.f32.partialorder %v3285_v42, %v3522_v38  ;;  %vm1540_vm10 = vcmp.eq.f32.partialorder %v3285_v42, %v3366_v48 }
 0x523   : > { %2635 = vmatpush3.msra.mxu1 %v1511_v15  ;;  %v1648_v43 = vsel %vm1613_vm9, %v3399_v5, 0.0  ;;  %v1575_v25 = vsel %vm1540_vm10, %v3388_v62, 0.0  ;;  %vm1615_vm11 = vcmp.eq.f32.partialorder %v3285_v42, %v3532_v2  ;;  %vm1542_vm12 = vcmp.eq.f32.partialorder %v3295_v30, %v3355_v27 }
 0x524   : > { %2486 = vmatmul.mubr.msk.f32.gmra.mrb[20].mxu0 %vm1684_vm5, %v3548_v60  ;;  %v3599_v21 = vadd.f32 %v1648_v43, %v1573_v23  ;;  %v1650_v56 = vsel %vm1615_vm11, %v3405_v7, 0.0  ;;  %v1577_v35 = vsel %vm1542_vm12, %v3373_v53, 0.0  ;;  %vm1617_vm13 = vcmp.eq.f32.partialorder %v3295_v30, %v3492_v37  ;;  %v3617_v53 = vld [vmem:[%s3458_s26 + $0x28] sm:$0xff] }
 0x525   : > { %1946 = vmatprep.mubr.f32.mxu0 %v2817_v57  ;;  %2475 = vmatmul.mubr.msk.f32.gmra.mrb[24].mxu1 %vm1684_vm5, %v3582_v10  ;;  %v3608_v34 = vadd.f32 %v1650_v56, %v1575_v25  ;;  %v1652_v27 = vsel %vm1617_vm13, %v3396_v4, 0.0  ;;  %vm1544_vm14 = vcmp.eq.f32.partialorder %v3295_v30, %v3363_v47  ;;  %vm1619_vm15 = vcmp.eq.f32.partialorder %v3295_v30, %v3516_v32 }
 0x526   : > { %1815 = vmatprep.mubr.f32.mxu1 %v2817_v57  ;;  %v3619_v37 = vadd.f32 %v1652_v27, %v1577_v35  ;;  %v1579_v22 = vsel %vm1544_vm14, %v3381_v58, 0.0  ;;  %v1654_v29 = vsel %vm1619_vm15, %v3402_v6, 0.0  ;;  %vm1543_vm0 = vcmp.eq.f32.partialorder %v3295_v30, %v3358_v14 }
 0x527   : > { %v3625_v4 = vadd.f32 %v1654_v29, %v1579_v22  ;;  %v1578_v47 = vsel %vm1543_vm0, %v3378_v55, 0.0  ;;  %vm1618_vm2 = vcmp.eq.f32.partialorder %v3295_v30, %v3522_v38  ;;  %vm1545_vm3 = vcmp.eq.f32.partialorder %v3295_v30, %v3366_v48 }
 0x528   : > { %2487 = vmatmul.mubr.msk.f32.gmra.mrb[22].mxu0 %vm1684_vm5, %v3582_v10  ;;  %v1653_v58 = vsel %vm1618_vm2, %v3399_v5, 0.0  ;;  %v1580_v6 = vsel %vm1545_vm3, %v3388_v62, 0.0  ;;  %vm1620_vm4 = vcmp.eq.f32.partialorder %v3295_v30, %v3532_v2  ;;  %vm1541_vm6 = vcmp.eq.f32.partialorder %v3285_v42, %v3370_v49  ;;  %v1678_v5 = vld [vmem:[%s3458_s26 + $0x30] sm:$0xff] }
 0x529   : > { %1952 = vmatprep.mubr.f32.mxu0 %v2817_v57  ;;  %2476 = vmatmul.mubr.msk.f32.gmra.mrb[26].mxu1 %vm1684_vm5, %v3617_v53  ;;  %v3643_v14 = vadd.f32 %v1653_v58, %v1578_v47  ;;  %v1655_v48 = vsel %vm1620_vm4, %v3405_v7, 0.0  ;;  %v1576_v55 = vsel %vm1541_vm6, %v3391_v63, 0.0  ;;  %v1606_v62 = vrot.slane %v3535_v19, %v3273_v3 }
 0x52a   : > { %1821 = vmatprep.mubr.f32.mxu1 %v2817_v57  ;;  %v3651_v31 = vadd.f32 %v1655_v48, %v1580_v6  ;;  %vm1536_vm7 = vcmp.eq.f32.partialorder %v3283_v41, %v3370_v49  ;;  %vm1546_vm8 = vcmp.eq.f32.partialorder %v3295_v30, %v3370_v49  ;;  %vm2351_vm12 = vcmask 1042432  }
 0x52b   : > { %vm1616_vm9 = vcmp.eq.f32.partialorder %v3285_v42, %v1606_v62  ;;  %v1571_v7 = vsel %vm1536_vm7, %v3391_v63, 0.0  ;;  %vm1611_vm10 = vcmp.eq.f32.partialorder %v3283_v41, %v1606_v62  ;;  %v1581_v3 = vsel %vm1546_vm8, %v3391_v63, 0.0  ;;  %v1679_v63 = vld [vmem:[%s3458_s26 + $0x38] sm:$0xff] }
 0x52c   : > { %2488 = vmatmul.mubr.msk.f32.gmra.mrb[24].mxu0 %vm1684_vm5, %v3617_v53  ;;  %v1651_v36 = vsel %vm1616_vm9, %v3408_v8, 0.0  ;;  %v1646_v54 = vsel %vm1611_vm10, %v3408_v8, 0.0  ;;  %vm1621_vm11 = vcmp.eq.f32.partialorder %v3295_v30, %v1606_v62  ;;  %v1680_v30 = vld [vmem:[%s3458_s26 + $0x40] sm:$0xff] }
 0x52d   : > { %1958 = vmatprep.mubr.f32.mxu0 %v2817_v57  ;;  %2477 = vmatmul.mubr.msk.f32.gmra.mrb[28].mxu1 %vm1684_vm5, %v1678_v5  ;;  %v3668_v42 = vadd.f32 %v1651_v36, %v1576_v55  ;;  %v3670_v41 = vadd.f32 %v1646_v54, %v1571_v7  ;;  %v1656_v49 = vsel %vm1621_vm11, %v3408_v8, 0.0  ;;  %v1681_v8 = vld [vmem:[%s3458_s26 + $0x48] sm:$0xff] }
 0x52e   : > { %1827 = vmatprep.mubr.f32.mxu1 %v2817_v57  ;;  %v3675_v44 = vadd.f32 %v1656_v49, %v1581_v3 }
 0x530   : > { %2489 = vmatmul.mubr.msk.f32.gmra.mrb[26].mxu0 %vm1684_vm5, %v1678_v5 }
 0x531   : > { %1964 = vmatprep.mubr.f32.mxu0 %v2817_v57  ;;  %2478 = vmatmul.mubr.msk.f32.gmra.mrb[30].mxu1 %vm1684_vm5, %v1679_v63 }
 0x532   : > { %1833 = vmatprep.mubr.f32.mxu1 %v2817_v57 }
 0x534   : > { %2490 = vmatmul.mubr.msk.f32.gmra.mrb[28].mxu0 %vm1684_vm5, %v1679_v63 }
 0x535   : > { %1970 = vmatprep.mubr.f32.mxu0 %v2817_v57  ;;  %2479 = vmatmul.mubr.msk.f32.gmra.mrb[32].mxu1 %vm1684_vm5, %v1680_v30 }
 0x536   : > { %1839 = vmatprep.mubr.f32.mxu1 %v2817_v57 }
 0x538   : > { %2491 = vmatmul.mubr.msk.f32.gmra.mrb[30].mxu0 %vm1684_vm5, %v1680_v30 }
 0x539   : > { %1976 = vmatprep.mubr.f32.mxu0 %v2817_v57  ;;  %2480 = vmatmul.mubr.msk.f32.gmra.mrb[34].mxu1 %vm1684_vm5, %v1681_v8 }
 0x53a   : > { %1845 = vmatprep.mubr.f32.mxu1 %v2817_v57 }
 0x53c   : > { %2492 = vmatmul.mubr.msk.f32.gmra.mrb[32].mxu0 %vm1684_vm5, %v1681_v8 }
 0x53d   : > { %1982 = vmatprep.mubr.f32.mxu0 %v2817_v57  ;;  %2481 = vmatmul.mubr.msk.f32.gmra.mrb[36].mxu1 %vm1684_vm5, %v1682_v45 }
 0x53e   : > { %1851 = vmatprep.mubr.f32.mxu1 %v2817_v57 }
 0x540   : > { %2493 = vmatmul.mubr.msk.f32.gmra.mrb[34].mxu0 %vm1684_vm5, %v1682_v45 }
 0x541   : > { %1988 = vmatprep.mubr.f32.mxu0 %v2817_v57  ;;  %2482 = vmatmul.mubr.msk.f32.gmra.mrb[38].mxu1 %vm1684_vm5, %v1683_v46 }
 0x542   : > { %2636 = vmatprep.mubr.msk.f32.mxu1 %vm1684_vm5, %v3467_v33 }
 0x544   : > { %2494 = vmatmul.mubr.msk.f32.gmra.mrb[36].mxu0 %vm1684_vm5, %v1683_v46 }
 0x545   : > { %2637 = vmatmul.mubr.msk.f32.vlgmr.msra.gmra.mrb[40].mxu1 %vm1684_vm5, %v3487_v28 }
 0x546   : > { %2639 = vmatprep.mubr.msk.f32.mxu1 %vm1684_vm5, %v3510_v12 }
 0x549   : > { %2640 = vmatmul.mubr.msk.f32.gmra.mrb[42].mxu1 %vm1684_vm5, %v3548_v60 }
 0x54a   : > { %2642 = vmatprep.mubr.msk.f32.mxu1 %vm1684_vm5, %v3582_v10 }
 0x54d   : > { %2643 = vmatmul.mubr.msk.f32.gmra.mrb[44].mxu1 %vm1684_vm5, %v3617_v53 }
 0x54e   : > { %2645 = vmatprep.mubr.msk.f32.mxu1 %vm1684_vm5, %v1678_v5 }
 0x551   : > { %2646 = vmatmul.mubr.msk.f32.gmra.mrb[46].mxu1 %vm1684_vm5, %v1679_v63 }
 0x552   : > { %2648 = vmatprep.mubr.msk.f32.mxu1 %vm1684_vm5, %v1680_v30 }
 0x555   : > { %2649 = vmatmul.mubr.msk.f32.gmra.mrb[48].mxu1 %vm1684_vm5, %v1681_v8 }
 0x556   : > { %2651 = vmatprep.mubr.msk.f32.mxu1 %vm1684_vm5, %v1682_v45 }
 0x559   : > { %2652 = vmatmul.mubr.msk.f32.gmra.mrb[50].mxu1 %vm1684_vm5, %v1683_v46  ;;  %vm2340_vm5 = vcmask 1040384  }
 0x5e8   : > { %v1787_v57 = vpop.f32.mrb[16].mxu1 }
 0x5e9   : > { %v2120_v33 = vmul.f32 %v1787_v57, %v3512_v16  ;;  %v1789_v28 = vpop.f32.mrb[17].mxu1 }
 0x5ea   : > { %v2121_v51 = vmul.f32 %v1789_v28, %v3557_v59 }
 0x5eb   : > { %v1924_v52 = vpop.f32.mrb[14].mxu0 }
 0x5ec   : > { %v2122_v15 = vmul.f32 %v1924_v52, %v3555_v20  ;;  %v1926_v12 = vpop.f32.mrb[15].mxu0  ;;  %v1793_v32 = vpop.f32.mrb[18].mxu1 }
 0x5ed   : > { %v2123_v38 = vmul.f32 %v1926_v12, %v3564_v13  ;;  %v2125_v40 = vmul.f32 %v1793_v32, %v3574_v17  ;;  %v1795_v50 = vpop.f32.mrb[19].mxu1 }
 0x5ee   : > { %v2126_v61 = vmul.f32 %v1795_v50, %v3599_v21 }
 0x5ef   : > { %v2135_v2 = vadd.f32 %v2125_v40, %v2120_v33  ;;  %v1930_v19 = vpop.f32.mrb[16].mxu0 }
 0x5f0   : > { %v2127_v60 = vmul.f32 %v1930_v19, %v3584_v1  ;;  %v2143_v24 = vadd.f32 %v2126_v61, %v2121_v51  ;;  %v1932_v0 = vpop.f32.mrb[17].mxu0  ;;  %v1799_v11 = vpop.f32.mrb[20].mxu1 }
 0x5f1   : > { %v2128_v9 = vmul.f32 %v1932_v0, %v3608_v34  ;;  %v2130_v26 = vmul.f32 %v1799_v11, %v3619_v37  ;;  %v1801_v39 = vpop.f32.mrb[21].mxu1 }
 0x5f2   : > { %v2151_v18 = vadd.f32 %v2127_v60, %v2122_v15  ;;  %v2131_v10 = vmul.f32 %v1801_v39, %v3643_v14 }
 0x5f3   : > { %v2159_v23 = vadd.f32 %v2128_v9, %v2123_v38  ;;  %v2136_v43 = vadd.f32 %v2135_v2, %v2130_v26  ;;  %v1936_v25 = vpop.f32.mrb[18].mxu0 }
 0x5f4   : > { %v2132_v56 = vmul.f32 %v1936_v25, %v3625_v4  ;;  %v2144_v35 = vadd.f32 %v2143_v24, %v2131_v10  ;;  %v1938_v27 = vpop.f32.mrb[19].mxu0  ;;  %v1805_v53 = vpop.f32.mrb[22].mxu1 }
 0x5f5   : > { %v2137_v22 = vrot.slane %v2136_v43, 4  ;;  %v2133_v29 = vmul.f32 %v1938_v27, %v3651_v31  ;;  %v2175_v47 = vmul.f32 %v1805_v53, %v3512_v16  ;;  %v1807_v58 = vpop.f32.mrb[23].mxu1 }
 0x5f6   : > { %v2152_v6 = vadd.f32 %v2151_v18, %v2132_v56  ;;  %v2145_v48 = vrot.slane %v2144_v35, 4  ;;  %v2176_v55 = vmul.f32 %v1807_v58, %v3557_v59 }
 0x5f7   : > { %v2138_v62 = vadd.f32 %v2137_v22, %v2136_v43  ;;  %v2160_v5 = vadd.f32 %v2159_v23, %v2133_v29  ;;  %v1942_v7 = vpop.f32.mrb[20].mxu0 }
 0x5f8   : > { %v2153_v3 = vrot.slane %v2152_v6, 4  ;;  %v2146_v36 = vadd.f32 %v2145_v48, %v2144_v35  ;;  %v2177_v54 = vmul.f32 %v1942_v7, %v3555_v20  ;;  %v1944_v49 = vpop.f32.mrb[21].mxu0  ;;  %v1811_v63 = vpop.f32.mrb[24].mxu1 }
 0x5f9   : > { %v2139_v30 = vrot.slane %v2138_v62, 2  ;;  %v2161_v8 = vrot.slane %v2160_v5, 4  ;;  %v2178_v45 = vmul.f32 %v1944_v49, %v3564_v13  ;;  %v2180_v46 = vmul.f32 %v1811_v63, %v3574_v17  ;;  %v1813_v57 = vpop.f32.mrb[25].mxu1 }
 0x5fa   : > { %v2154_v33 = vadd.f32 %v2153_v3, %v2152_v6  ;;  %v2147_v28 = vrot.slane %v2146_v36, 2  ;;  %v2181_v51 = vmul.f32 %v1813_v57, %v3599_v21 }
 0x5fb   : > { %v2140_v52 = vadd.f32 %v2139_v30, %v2138_v62  ;;  %v2162_v15 = vadd.f32 %v2161_v8, %v2160_v5  ;;  %v2190_v12 = vadd.f32 %v2180_v46, %v2175_v47  ;;  %v1948_v32 = vpop.f32.mrb[22].mxu0 }
 0x5fc   : > { %v2155_v38 = vrot.slane %v2154_v33, 2  ;;  %v2148_v40 = vadd.f32 %v2147_v28, %v2146_v36  ;;  %v2182_v50 = vmul.f32 %v1948_v32, %v3584_v1  ;;  %v2198_v61 = vadd.f32 %v2181_v51, %v2176_v55  ;;  %v1950_v2 = vpop.f32.mrb[23].mxu0  ;;  %v1817_v19 = vpop.f32.mrb[26].mxu1 }
 0x5fd   : > { %v2163_v60 = vrot.slane %v2162_v15, 2  ;;  %v2183_v24 = vmul.f32 %v1950_v2, %v3608_v34  ;;  %v2185_v0 = vmul.f32 %v1817_v19, %v3619_v37  ;;  %v1819_v11 = vpop.f32.mrb[27].mxu1  ;;  %v2141_v18 = vrot.slane %v2140_v52, 1 }
 0x5fe   : > { %v2156_v9 = vadd.f32 %v2155_v38, %v2154_v33  ;;  %v2206_v26 = vadd.f32 %v2182_v50, %v2177_v54  ;;  %v2186_v39 = vmul.f32 %v1819_v11, %v3643_v14  ;;  %v2149_v56 = vrot.slane %v2148_v40, 1 }
 0x5ff   : > { %v2164_v10 = vadd.f32 %v2163_v60, %v2162_v15  ;;  %v2214_v23 = vadd.f32 %v2183_v24, %v2178_v45  ;;  %v2191_v43 = vadd.f32 %v2190_v12, %v2185_v0  ;;  %v1954_v25 = vpop.f32.mrb[24].mxu0  ;;  %v2142_v7 = vadd.f32 %v2141_v18, %v2140_v52 }
 0x600   : > { %v2187_v35 = vmul.f32 %v1954_v25, %v3625_v4  ;;  %v2199_v27 = vadd.f32 %v2198_v61, %v2186_v39  ;;  %v1956_v53 = vpop.f32.mrb[25].mxu0  ;;  %v1823_v22 = vpop.f32.mrb[28].mxu1  ;;  %v2157_v48 = vrot.slane %v2156_v9, 1  ;;  %v2150_v63 = vadd.f32 %v2149_v56, %v2148_v40 }
 0x601   : > { %v2192_v29 = vrot.slane %v2191_v43, 4  ;;  %v2188_v47 = vmul.f32 %v1956_v53, %v3651_v31  ;;  %v2230_v58 = vmul.f32 %v1823_v22, %v3512_v16  ;;  %v1825_v6 = vpop.f32.mrb[29].mxu1  ;;  %v2165_v3 = vrot.slane %v2164_v10, 1 }
 0x602   : > { %v2207_v55 = vadd.f32 %v2206_v26, %v2187_v35  ;;  %v2200_v62 = vrot.slane %v2199_v27, 4  ;;  %v2231_v5 = vmul.f32 %v1825_v6, %v3557_v59  ;;  %v2158_v32 = vadd.f32 %v2157_v48, %v2156_v9 }
 0x603   : > { %v2193_v36 = vadd.f32 %v2192_v29, %v2191_v43  ;;  %v2215_v54 = vadd.f32 %v2214_v23, %v2188_v47  ;;  %v1960_v49 = vpop.f32.mrb[26].mxu0  ;;  %v2166_v61 = vadd.f32 %v2165_v3, %v2164_v10 }
 0x604   : > { %v2208_v30 = vrot.slane %v2207_v55, 4  ;;  %v2201_v8 = vadd.f32 %v2200_v62, %v2199_v27  ;;  %v2232_v45 = vmul.f32 %v1960_v49, %v3555_v20  ;;  %v1962_v46 = vpop.f32.mrb[27].mxu0  ;;  %v1829_v57 = vpop.f32.mrb[30].mxu1 }
 0x605   : > { %v2194_v33 = vrot.slane %v2193_v36, 2  ;;  %v2216_v28 = vrot.slane %v2215_v54, 4  ;;  %v2233_v51 = vmul.f32 %v1962_v46, %v3564_v13  ;;  %v2235_v15 = vmul.f32 %v1829_v57, %v3574_v17  ;;  %v1831_v12 = vpop.f32.mrb[31].mxu1 }
 0x606   : > { %v2209_v52 = vadd.f32 %v2208_v30, %v2207_v55  ;;  %v2202_v38 = vrot.slane %v2201_v8, 2  ;;  %v2236_v50 = vmul.f32 %v1831_v12, %v3599_v21 }
 0x607   : > { %v2195_v40 = vadd.f32 %v2194_v33, %v2193_v36  ;;  %v2217_v2 = vadd.f32 %v2216_v28, %v2215_v54  ;;  %v2245_v19 = vadd.f32 %v2235_v15, %v2230_v58  ;;  %v1966_v60 = vpop.f32.mrb[28].mxu0 }
 0x608   : > { %v2210_v24 = vrot.slane %v2209_v52, 2  ;;  %v2203_v0 = vadd.f32 %v2202_v38, %v2201_v8  ;;  %v2237_v11 = vmul.f32 %v1966_v60, %v3584_v1  ;;  %v2253_v26 = vadd.f32 %v2236_v50, %v2231_v5  ;;  %v1968_v39 = vpop.f32.mrb[29].mxu0  ;;  %v1835_v18 = vpop.f32.mrb[32].mxu1 }
 0x609   : > { %v2196_v23 = vrot.slane %v2195_v40, 1  ;;  %v2218_v43 = vrot.slane %v2217_v2, 2  ;;  %v2238_v9 = vmul.f32 %v1968_v39, %v3608_v34  ;;  %v2240_v25 = vmul.f32 %v1835_v18, %v3619_v37  ;;  %v1837_v56 = vpop.f32.mrb[33].mxu1 }
 0x60a   : > { %v2211_v35 = vadd.f32 %v2210_v24, %v2209_v52  ;;  %v2204_v10 = vrot.slane %v2203_v0, 1  ;;  %v2261_v27 = vadd.f32 %v2237_v11, %v2232_v45  ;;  %v2241_v53 = vmul.f32 %v1837_v56, %v3643_v14 }
 0x60b   : > { %v2197_v22 = vadd.f32 %v2196_v23, %v2195_v40  ;;  %v2219_v29 = vadd.f32 %v2218_v43, %v2217_v2  ;;  %v2269_v47 = vadd.f32 %v2238_v9, %v2233_v51  ;;  %v2246_v58 = vadd.f32 %v2245_v19, %v2240_v25  ;;  %v1972_v6 = vpop.f32.mrb[30].mxu0 }
 0x60c   : > { %v2212_v48 = vrot.slane %v2211_v35, 1  ;;  %v2205_v55 = vadd.f32 %v2204_v10, %v2203_v0  ;;  %v2242_v62 = vmul.f32 %v1972_v6, %v3625_v4  ;;  %v2254_v5 = vadd.f32 %v2253_v26, %v2241_v53  ;;  %v1974_v3 = vpop.f32.mrb[31].mxu0  ;;  %v1841_v36 = vpop.f32.mrb[34].mxu1 }
 0x60d   : > { %v2341_v54 = vsel %vm2340_vm5, %v2142_v7, %v2197_v22  ;;  %v2220_v49 = vrot.slane %v2219_v29, 1  ;;  %v2247_v30 = vrot.slane %v2246_v58, 4  ;;  %v2243_v8 = vmul.f32 %v1974_v3, %v3651_v31  ;;  %v1843_v45 = vpop.f32.mrb[35].mxu1 }
 0x60e   : > { %v2213_v46 = vadd.f32 %v2212_v48, %v2211_v35  ;;  %v2342_v57 = vsel %vm2340_vm5, %v2150_v63, %v2205_v55  ;;  %v2262_v33 = vadd.f32 %v2261_v27, %v2242_v62  ;;  %v2255_v28 = vrot.slane %v2254_v5, 4 }
 0x60f   : > { %v2221_v51 = vadd.f32 %v2220_v49, %v2219_v29  ;;  %v2248_v15 = vadd.f32 %v2247_v30, %v2246_v58  ;;  %v2270_v12 = vadd.f32 %v2269_v47, %v2243_v8  ;;  %v2285_v52 = vmul.f32 %v1841_v36, %v3512_v16  ;;  %v1978_v38 = vpop.f32.mrb[32].mxu0 }
 0x610   : > { %v2343_v50 = vsel %vm2340_vm5, %v2158_v32, %v2213_v46  ;;  %v2263_v40 = vrot.slane %v2262_v33, 4  ;;  %v2256_v7 = vadd.f32 %v2255_v28, %v2254_v5  ;;  %v2287_v2 = vmul.f32 %v1978_v38, %v3555_v20  ;;  %v1980_v19 = vpop.f32.mrb[33].mxu0  ;;  %v1847_v60 = vpop.f32.mrb[36].mxu1 }
 0x611   : > { %v2344_v24 = vsel %vm2340_vm5, %v2166_v61, %v2221_v51  ;;  %v2249_v0 = vrot.slane %v2248_v15, 2  ;;  %v2271_v63 = vrot.slane %v2270_v12, 4  ;;  %v2286_v11 = vmul.f32 %v1843_v45, %v3557_v59  ;;  %v1849_v26 = vpop.f32.mrb[37].mxu1 }
 0x612   : > { %v2264_v39 = vadd.f32 %v2263_v40, %v2262_v33  ;;  %v2257_v18 = vrot.slane %v2256_v7, 2  ;;  %v2288_v16 = vmul.f32 %v1980_v19, %v3564_v13  ;;  %v2290_v23 = vmul.f32 %v1847_v60, %v3574_v17 }
 0x613   : > { %v2250_v32 = vadd.f32 %v2249_v0, %v2248_v15  ;;  %v2272_v43 = vadd.f32 %v2271_v63, %v2270_v12  ;;  %v1984_v9 = vpop.f32.mrb[34].mxu0  ;;  %v2291_v20 = vmul.f32 %v1849_v26, %v3599_v21 }
 0x614   : > { %v2265_v25 = vrot.slane %v2264_v39, 2  ;;  %v2258_v56 = vadd.f32 %v2257_v18, %v2256_v7  ;;  %v2300_v35 = vadd.f32 %v2290_v23, %v2285_v52  ;;  %v2292_v61 = vmul.f32 %v1984_v9, %v3584_v1  ;;  %v1986_v10 = vpop.f32.mrb[35].mxu0  ;;  %v1853_v27 = vpop.f32.mrb[38].mxu1 }
 0x615   : > { %v2251_v59 = vrot.slane %v2250_v32, 1  ;;  %v2273_v53 = vrot.slane %v2272_v43, 2  ;;  %v2308_v22 = vadd.f32 %v2291_v20, %v2286_v11  ;;  %v2293_v29 = vmul.f32 %v1986_v10, %v3608_v34  ;;  %v1855_v13 = vpop.f32.mrb[39].mxu1 }
 0x616   : > { %v2266_v47 = vadd.f32 %v2265_v25, %v2264_v39  ;;  %v2259_v17 = vrot.slane %v2258_v56, 1  ;;  %v2316_v58 = vadd.f32 %v2292_v61, %v2287_v2  ;;  %v2295_v6 = vmul.f32 %v1853_v27, %v3619_v37 }
 0x617   : > { %v2252_v48 = vadd.f32 %v2251_v59, %v2250_v32  ;;  %v2274_v21 = vadd.f32 %v2273_v53, %v2272_v43  ;;  %v2324_v55 = vadd.f32 %v2293_v29, %v2288_v16  ;;  %v1990_v62 = vpop.f32.mrb[36].mxu0  ;;  %v2296_v5 = vmul.f32 %v1855_v13, %v3643_v14 }
 0x618   : > { %v2267_v1 = vrot.slane %v2266_v47, 1  ;;  %v2260_v3 = vadd.f32 %v2259_v17, %v2258_v56  ;;  %v2301_v36 = vadd.f32 %v2300_v35, %v2295_v6  ;;  %v2297_v49 = vmul.f32 %v1990_v62, %v3625_v4  ;;  %v1992_v30 = vpop.f32.mrb[37].mxu0  ;;  %v2638_v8 = vpop.f32.mrb[40].mxu1 }
 0x619   : > { %v2346_v34 = vsel %vm799_vm1, %v2341_v54, %v2252_v48  ;;  %v2275_v45 = vrot.slane %v2274_v21, 1  ;;  %v2309_v46 = vadd.f32 %v2308_v22, %v2296_v5  ;;  %v2298_v33 = vmul.f32 %v1992_v30, %v3651_v31  ;;  %v2061_v37 = vpop.f32.mrb[41].mxu1 }
 0x61a   : > { %v2268_v28 = vadd.f32 %v2267_v1, %v2266_v47  ;;  %v2347_v51 = vsel %vm799_vm1, %v2342_v57, %v2260_v3  ;;  %v2302_v15 = vrot.slane %v2301_v36, 4  ;;  %v2317_v12 = vadd.f32 %v2316_v58, %v2297_v49 }
 0x61b   : > { %v2276_v14 = vadd.f32 %v2275_v45, %v2274_v21  ;;  %v2310_v52 = vrot.slane %v2309_v46, 4  ;;  %v2325_v38 = vadd.f32 %v2324_v55, %v2298_v33  ;;  %v2129_v40 = vmul.f32 %v2638_v8, %v3668_v42 }
 0x61c   : > { %v2348_v4 = vsel %vm799_vm1, %v2343_v50, %v2268_v28  ;;  %v2303_v7 = vadd.f32 %v2302_v15, %v2301_v36  ;;  %v2318_v2 = vrot.slane %v2317_v12, 4  ;;  %v2124_v54 = vmul.f32 %v2061_v37, %v3670_v41  ;;  %v2641_v19 = vpop.f32.mrb[42].mxu1 }
 0x61d   : > { %v2349_v31 = vsel %vm799_vm1, %v2344_v24, %v2276_v14  ;;  %v2311_v60 = vadd.f32 %v2310_v52, %v2309_v46  ;;  %v2326_v0 = vrot.slane %v2325_v38, 4  ;;  %v2179_v57 = vmul.f32 %v2641_v19, %v3670_v41  ;;  %v2071_v63 = vpop.f32.mrb[43].mxu1 }
 0x61e   : > { %v2304_v11 = vrot.slane %v2303_v7, 2  ;;  %v2319_v26 = vadd.f32 %v2318_v2, %v2317_v12  ;;  %v2167_v39 = vadd.f32 %v2129_v40, %v2124_v54  ;;  %v2134_v18 = vmul.f32 %v2071_v63, %v3675_v44 }
 0x61f   : > { %v2312_v16 = vrot.slane %v2311_v60, 2  ;;  %v2327_v50 = vadd.f32 %v2326_v0, %v2325_v38 }
 0x620   : > { %v2305_v23 = vadd.f32 %v2304_v11, %v2303_v7  ;;  %v2320_v32 = vrot.slane %v2319_v26, 2  ;;  %v2168_v43 = vadd.f32 %v2167_v39, %v2134_v18  ;;  %v2644_v9 = vpop.f32.mrb[44].mxu1 }
 0x621   : > { %v2313_v20 = vadd.f32 %v2312_v16, %v2311_v60  ;;  %v2328_v25 = vrot.slane %v2327_v50, 2  ;;  %v2189_v24 = vmul.f32 %v2644_v9, %v3675_v44  ;;  %v2081_v56 = vpop.f32.mrb[45].mxu1 }
 0x622   : > { %v2306_v35 = vrot.slane %v2305_v23, 1  ;;  %v2321_v61 = vadd.f32 %v2320_v32, %v2319_v26  ;;  %v2169_v10 = vrot.slane %v2168_v43, 4  ;;  %v2184_v27 = vmul.f32 %v2081_v56, %v3668_v42 }
 0x623   : > { %v2314_v59 = vrot.slane %v2313_v20, 1  ;;  %v2329_v53 = vadd.f32 %v2328_v25, %v2327_v50 }
 0x624   : > { %v2307_v22 = vadd.f32 %v2306_v35, %v2305_v23  ;;  %v2322_v29 = vrot.slane %v2321_v61, 1  ;;  %v2170_v13 = vadd.f32 %v2169_v10, %v2168_v43  ;;  %v2222_v47 = vadd.f32 %v2184_v27, %v2179_v57  ;;  %v2647_v17 = vpop.f32.mrb[46].mxu1 }
 0x625   : > { %v2315_v58 = vadd.f32 %v2314_v59, %v2313_v20  ;;  %v2330_v6 = vrot.slane %v2329_v53, 1  ;;  %v2239_v48 = vmul.f32 %v2647_v17, %v3668_v42  ;;  %v2091_v21 = vpop.f32.mrb[47].mxu1 }
 0x626   : > { %v2352_v55 = vsel %vm2351_vm12, %v2346_v34, %v2307_v22  ;;  %v2323_v62 = vadd.f32 %v2322_v29, %v2321_v61  ;;  %v2171_v5 = vrot.slane %v2170_v13, 2  ;;  %v2223_v1 = vadd.f32 %v2222_v47, %v2189_v24 }
 0x627   : > { %v2353_v3 = vsel %vm2351_vm12, %v2347_v51, %v2315_v58  ;;  %v2331_v36 = vadd.f32 %v2330_v6, %v2329_v53  ;;  %v2234_v49 = vmul.f32 %v2091_v21, %v3670_v41 }
 0x628   : > { %v2354_v30 = vsel %vm2351_vm12, %v2348_v4, %v2323_v62  ;;  %v2361_v8 = vcombine.low %v2352_v55, %v2353_v3  ;;  %v2224_v45 = vrot.slane %v2223_v1, 4  ;;  %v2650_v34 = vpop.f32.mrb[48].mxu1  ;;  %v2172_v12 = vadd.f32 %v2171_v5, %v2170_v13 }
 0x629   : > { %v2355_v46 = vsel %vm2351_vm12, %v2349_v31, %v2331_v36  ;;  %v2277_v33 = vadd.f32 %v2239_v48, %v2234_v49  ;;  %v2289_v37 = vmul.f32 %v2650_v34, %v3670_v41  ;;  %v2101_v28 = vpop.f32.mrb[49].mxu1 }
 0x62a   : > { %2365 = vst [vmem:[%s3787_s14] sm:$0xff] %v2361_v8  ;;  %v2362_v15 = vcombine.low %v2354_v30, %v2355_v46  ;;  %v2225_v14 = vadd.f32 %v2224_v45, %v2223_v1  ;;  %v2244_v51 = vmul.f32 %v2101_v28, %v3675_v44  ;;  %v2173_v2 = vrot.slane %v2172_v12, 1 }
 0x62c   : > { %2366 = vst [vmem:[%s3787_s14 + $0x8] sm:$0xff] %v2362_v15  ;;  %v2226_v52 = vrot.slane %v2225_v14, 2  ;;  %v2278_v38 = vadd.f32 %v2277_v33, %v2244_v51  ;;  %v2653_v40 = vpop.f32.mrb[50].mxu1  ;;  %v2174_v57 = vadd.f32 %v2173_v2, %v2172_v12 }
 0x62d   : > { %v2299_v4 = vmul.f32 %v2653_v40, %v3675_v44  ;;  %v2111_v7 = vpop.f32.mrb[51].mxu1 }
 0x62e   : > { %v2227_v54 = vadd.f32 %v2226_v52, %v2225_v14  ;;  %v2279_v19 = vrot.slane %v2278_v38, 4  ;;  %v2294_v31 = vmul.f32 %v2111_v7, %v3668_v42 }
 0x630   : > { %v2228_v41 = vrot.slane %v2227_v54, 1  ;;  %v2280_v60 = vadd.f32 %v2279_v19, %v2278_v38  ;;  %v2332_v0 = vadd.f32 %v2294_v31, %v2289_v37 }
 0x632   : > { %v2229_v63 = vadd.f32 %v2228_v41, %v2227_v54  ;;  %v2281_v11 = vrot.slane %v2280_v60, 2  ;;  %v2333_v26 = vadd.f32 %v2332_v0, %v2299_v4 }
 0x634   : > { %v2345_v39 = vsel %vm2340_vm5, %v2174_v57, %v2229_v63  ;;  %v2282_v18 = vadd.f32 %v2281_v11, %v2280_v60  ;;  %v2334_v16 = vrot.slane %v2333_v26, 4 }
 0x636   : > { %v2283_v50 = vrot.slane %v2282_v18, 1  ;;  %v2335_v44 = vadd.f32 %v2334_v16, %v2333_v26 }
 0x638   : > { %v2284_v23 = vadd.f32 %v2283_v50, %v2282_v18  ;;  %v2336_v32 = vrot.slane %v2335_v44, 2 }
 0x63a   : > { %v2350_v43 = vsel %vm799_vm1, %v2345_v39, %v2284_v23  ;;  %v2337_v9 = vadd.f32 %v2336_v32, %v2335_v44 }
 0x63c   : > { %v2338_v42 = vrot.slane %v2337_v9, 1 }
 0x63e   : > { %v2339_v20 = vadd.f32 %v2338_v42, %v2337_v9 }
 0x640   : > { %v2356_v25 = vsel %vm2351_vm12, %v2350_v43, %v2339_v20 }
 0x641   : > { %2367 = vst [vmem:[%s3787_s14 + $0x10] sm:$0xf] %v2356_v25 }
 0x642 PF: > { %s20_s13 = sadd.s32 1, %s2813_s13  }
 0x643   : > { %p17_p4 = scmp.ge.s32.totalorder %s20_s13, 4  }
 0x645   :  { %19 = sbr.rel (!%p17_p4) target bundleno = 1 (0x1), region = 93 }

</bundles_post_ra>
